<compile_context>
chip_gen: v6e
topology: v6e:2x2x1
jax: 0.10.0
libtpu: 0.0.40
codegen_flags: <defaults>
</compile_context>

<pallas_src>
import functools
import math

import jax
import jax.numpy as jnp
from jax.experimental import pallas as pl
from jax.experimental.pallas import tpu as pltpu

INV_SQRT_2 = 1.0 / math.sqrt(2.0)
_VMEM_LIMIT = 64 * 1024 * 1024  # raised scoped-VMEM limit (still <= v7x physical)


def _scaled_silu(x):
    # GemNet's ScaledSiLU activation used inside Dense layers (kept in f32).
    return jax.nn.silu(x) * (1.0 / 0.6)


def _round_up(x, m):
    return ((x + m - 1) // m) * m


# ---------------------------------------------------------------------------
# Stage 1: dense_ba -> elementwise * mlp_rbf(rad) -> scale_rbf -> down_projection
# ---------------------------------------------------------------------------
def _front_kernel(m_ref, rad_ref, w_ba_ref, w_rbf_ref, w_down_ref, out_ref):
    x_ba = _scaled_silu(
        jnp.dot(m_ref[...], w_ba_ref[...], preferred_element_type=jnp.float32))
    rad_emb = jnp.dot(rad_ref[...], w_rbf_ref[...],
                      preferred_element_type=jnp.float32)
    # scale_rbf is folded into w_down; keep the elementwise product in f32.
    x = (x_ba * rad_emb).astype(w_down_ref.dtype)
    out_ref[...] = _scaled_silu(
        jnp.dot(x, w_down_ref[...], preferred_element_type=jnp.float32)
    ).astype(out_ref.dtype)


# ---------------------------------------------------------------------------
# Stage 2: EfficientInteractionBilinear (+ scale_cbf_sum folded into weights)
# ---------------------------------------------------------------------------
def _bilinear_kernel_flat(sph_ref, m2_ref, rbf_ref, wbil_ref, out_ref):
    # sph:(be,S,K)  m2:(be,K,Ti)  rbf:(be,C,S)  wbil:(C*Ti,To)  out:(be,To)
    sum_k = jnp.einsum("esk,ekt->est", sph_ref[...], m2_ref[...],
                       preferred_element_type=jnp.float32)          # (be,S,Ti)
    rw = jnp.einsum("ecs,est->ect", rbf_ref[...],
                    sum_k.astype(rbf_ref.dtype),
                    preferred_element_type=jnp.float32)             # (be,C,Ti)
    be = rw.shape[0]
    # Single (C*Ti)-deep contraction, identical to the reference's reshape-matmul.
    rw_flat = rw.reshape(be, -1).astype(wbil_ref.dtype)             # (be,C*Ti)
    out_ref[...] = jnp.dot(rw_flat, wbil_ref[...],
                           preferred_element_type=jnp.float32).astype(out_ref.dtype)


def _bilinear_kernel_loop(sph_ref, m2_ref, rbf_ref, wbil_ref, out_ref):
    # Fallback (numerically identical): wbil:(C,Ti,To); accumulate over c.
    sum_k = jnp.einsum("esk,ekt->est", sph_ref[...], m2_ref[...],
                       preferred_element_type=jnp.float32)
    rw = jnp.einsum("ecs,est->ect", rbf_ref[...],
                    sum_k.astype(rbf_ref.dtype),
                    preferred_element_type=jnp.float32)
    C = rbf_ref.shape[1]
    acc = jnp.zeros(out_ref.shape, jnp.float32)
    for c in range(C):
        acc = acc + jnp.dot(rw[:, c, :].astype(wbil_ref.dtype), wbil_ref[c],
                            preferred_element_type=jnp.float32)
    out_ref[...] = acc.astype(out_ref.dtype)


# ---------------------------------------------------------------------------
# Stage 3: symmetric output projections: (act(x@Wca) + act(x_swap@Wac)) / sqrt(2)
# ---------------------------------------------------------------------------
def _out_kernel(x_ref, xsw_ref, w_ca_ref, w_ac_ref, out_ref):
    x_ca = _scaled_silu(
        jnp.dot(x_ref[...], w_ca_ref[...], preferred_element_type=jnp.float32))
    x_ac = _scaled_silu(
        jnp.dot(xsw_ref[...], w_ac_ref[...], preferred_element_type=jnp.float32))
    out_ref[...] = ((x_ca + x_ac) * INV_SQRT_2).astype(out_ref.dtype)


# ---------------------------------------------------------------------------
# Full TripletInteraction forward (symmetric_mp=True path)
# ---------------------------------------------------------------------------
def triplet_interaction(params, m, bases, idx, id_swap, *,
                        max_be=256,
                        mxu_dtype=jnp.bfloat16,
                        flat_bilinear=True):
    rbf_W1, sph = bases["cir"]
    rad = bases["rad"]
    E, H = m.shape
    R = rad.shape[1]
    C, S = rbf_W1.shape[1], rbf_W1.shape[2]
    K = sph.shape[2]
    Ti = params["w_down"].shape[1]
    To = params["w_ca"].shape[0]
    H_out = params["w_ca"].shape[1]
    cd = mxu_dtype

    cp = pltpu.CompilerParams(dimension_semantics=("parallel",),
                              vmem_limit_bytes=_VMEM_LIMIT)

    # ScaleFactor scalars folded into the next matmul weights (exact), then cast.
    w_ba = params["w_ba"].astype(cd)
    w_rbf = params["w_rbf"].astype(cd)
    w_down = (params["w_down"] * params["scale_rbf"]).astype(cd)
    w_bil = params["w_bil"] * params["scale_cbf_sum"]               # (C, Ti, To)
    w_ca = params["w_ca"].astype(cd)
    w_ac = params["w_ac"].astype(cd)

    # Edge tile: as large as sensible (amortize ~600-cycle grid-step overhead,
    # fill the MXU M dim), never larger than the (padded) edge count.
    be = min(max_be, _round_up(E, 8))
    E_pad = _round_up(E, be)
    pad = E_pad - E
    n_blk = pl.cdiv(E_pad, be)

    def pad_e(x):
        if pad == 0:
            return x
        return jnp.pad(x, ((0, pad),) + ((0, 0),) * (x.ndim - 1))

    # ---- Stage 1 (Pallas) ----------------------------------------------------
    x_down = pl.pallas_call(
        _front_kernel,
        out_shape=jax.ShapeDtypeStruct((E_pad, Ti), cd),
        grid=(n_blk,),
        in_specs=[
            pl.BlockSpec((be, H), lambda i: (i, 0)),
            pl.BlockSpec((be, R), lambda i: (i, 0)),
            pl.BlockSpec((H, H), lambda i: (0, 0)),
            pl.BlockSpec((R, H), lambda i: (0, 0)),
            pl.BlockSpec((H, Ti), lambda i: (0, 0)),
        ],
        out_specs=pl.BlockSpec((be, Ti), lambda i: (i, 0)),
        compiler_params=cp,
    )(pad_e(m.astype(cd)), pad_e(rad.astype(cd)), w_ba, w_rbf, w_down)

    # ---- Glue: triplet gather + zero-padded scatter (torch: m2[out, agg] = m) --
    x_trip = jnp.take(x_down, idx["in"], axis=0)                     # (T, Ti)
    m2 = jnp.zeros((E_pad, K, Ti), cd).at[
        idx["out"], idx["out_agg"]].set(x_trip)                      # (E_pad,K,Ti)

    # ---- Stage 2 (Pallas) ----------------------------------------------------
    if flat_bilinear:
        kern = _bilinear_kernel_flat
        wb = w_bil.reshape(C * Ti, To).astype(cd)
        wb_spec = pl.BlockSpec((C * Ti, To), lambda i: (0, 0))
    else:
        kern = _bilinear_kernel_loop
        wb = w_bil.astype(cd)
        wb_spec = pl.BlockSpec((C, Ti, To), lambda i: (0, 0, 0))
    x = pl.pallas_call(
        kern,
        out_shape=jax.ShapeDtypeStruct((E_pad, To), cd),
        grid=(n_blk,),
        in_specs=[
            pl.BlockSpec((be, S, K), lambda i: (i, 0, 0)),
            pl.BlockSpec((be, K, Ti), lambda i: (i, 0, 0)),
            pl.BlockSpec((be, C, S), lambda i: (i, 0, 0)),
            wb_spec,
        ],
        out_specs=pl.BlockSpec((be, To), lambda i: (i, 0)),
        compiler_params=cp,
    )(pad_e(sph.astype(cd)), m2, pad_e(rbf_W1.astype(cd)), wb)       # (E_pad, To)

    # ---- Glue: up_projection_ac(x)[id_swap] == up_projection_ac(x[id_swap]) ---
    x_sw = pad_e(jnp.take(x, id_swap, axis=0))                       # (E_pad, To)

    # ---- Stage 3 (Pallas) ----------------------------------------------------
    out = pl.pallas_call(
        _out_kernel,
        out_shape=jax.ShapeDtypeStruct((E_pad, H_out), jnp.float32),
        grid=(n_blk,),
        in_specs=[
            pl.BlockSpec((be, To), lambda i: (i, 0)),
            pl.BlockSpec((be, To), lambda i: (i, 0)),
            pl.BlockSpec((To, H_out), lambda i: (0, 0)),
            pl.BlockSpec((To, H_out), lambda i: (0, 0)),
        ],
        out_specs=pl.BlockSpec((be, H_out), lambda i: (i, 0)),
        compiler_params=cp,
    )(x, x_sw, w_ca, w_ac)
    return out[:E]


# ---------------------------------------------------------------------------
# Pure-JAX reference, mirrors the PyTorch forward line-by-line (f32).
# ---------------------------------------------------------------------------
def reference_forward(params, m, bases, idx, id_swap):
    act = _scaled_silu
    rbf_W1, sph = bases["cir"]
    E = rbf_W1.shape[0]
    K = sph.shape[2]
    Ti = params["w_down"].shape[1]
    C, To = params["w_bil"].shape[0], params["w_bil"].shape[2]

    x_ba = act(m @ params["w_ba"])                           # dense_ba
    rad_emb = bases["rad"] @ params["w_rbf"]                 # mlp_rbf
    x_ba = (x_ba * rad_emb) * params["scale_rbf"]            # scale_rbf
    x_ba = act(x_ba @ params["w_down"])                      # down_projection
    x_ba = x_ba[idx["in"]]
    m2 = jnp.zeros((E, K, Ti), jnp.float32).at[
        idx["out"], idx["out_agg"]].set(x_ba)
    sum_k = jnp.einsum("esk,ekt->est", sph, m2)
    rw = jnp.einsum("ecs,est->ect", rbf_W1, sum_k)
    x = rw.reshape(E, -1) @ params["w_bil"].reshape(C * Ti, To)   # bilinear
    x = x * params["scale_cbf_sum"]                               # scale_cbf_sum
    x_ca = act(x @ params["w_ca"])
    x_ac = act(x @ params["w_ac"])[id_swap]
    return (x_ca + x_ac) * INV_SQRT_2


if __name__ == "__main__":
    # Small, consistent sizes.
    E, T = 16, 32          # num edges, num triplets
    H = 32                 # emb_size_in == emb_size_out
    Ti, To = 16, 16        # emb_size_trip_in, emb_size_trip_out
    R, C = 16, 8           # emb_size_rbf, emb_size_cbf
    S, K = 8, 8            # num_spherical, Kmax

    key = jax.random.PRNGKey(0)
    keys = jax.random.split(key, 12)

    def init(k, shape, fan_in):
        return (jax.random.normal(k, shape, jnp.float32) /
                jnp.sqrt(jnp.float32(fan_in)))

    params = dict(
        w_ba=init(keys[0], (H, H), H),              # dense_ba (no bias)
        w_rbf=init(keys[1], (R, H), R),             # mlp_rbf (no bias)
        w_down=init(keys[2], (H, Ti), H),           # down_projection (no bias)
        w_bil=init(keys[3], (C, Ti, To), C * Ti),   # bilinear, torch W^T as (C,Ti,To)
        w_ca=init(keys[4], (To, H), To),            # up_projection_ca
        w_ac=init(keys[5], (To, H), To),            # up_projection_ac
        scale_rbf=jnp.float32(1.0),                 # ScaleFactor (inference scalar)
        scale_cbf_sum=jnp.float32(1.0),             # ScaleFactor (inference scalar)
    )

    m = jax.random.normal(keys[6], (E, H), jnp.float32)
    rad = jax.random.normal(keys[7], (E, R), jnp.float32)
    rbf_W1 = jax.random.normal(keys[8], (E, C, S), jnp.float32)
    sph = jax.random.normal(keys[9], (E, S, K), jnp.float32)
    bases = {"rad": rad, "cir": (rbf_W1, sph)}

    idx_in = jax.random.randint(keys[10], (T,), 0, E, dtype=jnp.int32)
    # Unique (outer, inner) pairs so the scatter matches torch index-assignment.
    idx_out = (jnp.arange(T, dtype=jnp.int32) % E)
    idx_out_agg = (jnp.arange(T, dtype=jnp.int32) // E)
    idx = {"in": idx_in, "out": idx_out, "out_agg": idx_out_agg}
    id_swap = jax.random.permutation(keys[11], E)

    ref = reference_forward(params, m, bases, idx, id_swap)

    def run(mxu_dtype, flat):
        fwd = jax.jit(functools.partial(
            triplet_interaction, max_be=256, mxu_dtype=mxu_dtype,
            flat_bilinear=flat))
        return jax.block_until_ready(fwd(params, m, bases, idx, id_swap))

    # Prefer the single (C*Ti)-deep bilinear matmul; if this Mosaic build rejects
    # the in-kernel (be,C,Ti)->(be,C*Ti) reshape, fall back (same numerics).
    try:
        out_f32 = run(jnp.float32, True)
        flat_ok = True
    except Exception:
        out_f32 = run(jnp.float32, False)
        flat_ok = False

    # Strict check in the f32 compute mode.
    assert out_f32.shape == (E, H) and out_f32.dtype == jnp.float32
    err = float(jnp.max(jnp.abs(out_f32 - ref)))
    assert err < 1e-4, err

    # Performance configuration: bf16 MXU operands, f32 accumulation.
    out_bf16 = run(jnp.bfloat16, flat_ok)
    err_bf = float(jnp.max(jnp.abs(out_bf16.astype(jnp.float32) - ref)))
    scale = float(jnp.max(jnp.abs(ref))) + 1e-6
    assert err_bf < 0.05 * scale + 0.05, err_bf

    print("KERNEL_OK")
</pallas_src>

<mosaic_0001>
module attributes {stable_mosaic.version = 11 : i64} {
  func.func @_front_kernel(%arg0: i32, %arg1: memref<16x32xf32, #tpu.memory_space<vmem>>, %arg2: memref<16x16xf32, #tpu.memory_space<vmem>>, %arg3: memref<32x32xf32, #tpu.memory_space<vmem>>, %arg4: memref<16x32xf32, #tpu.memory_space<vmem>>, %arg5: memref<32x16xf32, #tpu.memory_space<vmem>>, %arg6: memref<16x16xf32, #tpu.memory_space<vmem>>) attributes {dimension_semantics = [#tpu.dimension_semantics<parallel>], iteration_bounds = array<i64: 1>, scalar_prefetch = 0 : i64, scratch_operands = 0 : i64, tpu.core_type = #tpu.core_type<tc>, window_params = [{transform_indices = @transform_0, window_bounds = array<i64: 16, 32>}, {transform_indices = @transform_1, window_bounds = array<i64: 16, 16>}, {pipeline_mode = #tpu.pipeline_mode<synchronous>, transform_indices = @transform_2, window_bounds = array<i64: 32, 32>}, {pipeline_mode = #tpu.pipeline_mode<synchronous>, transform_indices = @transform_3, window_bounds = array<i64: 16, 32>}, {pipeline_mode = #tpu.pipeline_mode<synchronous>, transform_indices = @transform_4, window_bounds = array<i64: 32, 16>}, {transform_indices = @transform_5, window_bounds = array<i64: 16, 16>}]} {
    %c0 = arith.constant 0 : index
    %c0_0 = arith.constant 0 : index
    %0 = vector.load %arg1[%c0, %c0_0] : memref<16x32xf32, #tpu.memory_space<vmem>>, vector<16x32xf32>
    %c0_1 = arith.constant 0 : index
    %c0_2 = arith.constant 0 : index
    %1 = vector.load %arg3[%c0_1, %c0_2] : memref<32x32xf32, #tpu.memory_space<vmem>>, vector<32x32xf32>
    %cst = arith.constant dense<0.000000e+00> : vector<16x32xf32>
    %2 = tpu.matmul %0, %1, %cst {dimension_numbers = #tpu.dot_dimension_numbers<[1], [0], [0], [1], [0, 0, 1, 1], [], []>} : vector<16x32xf32>, vector<32x32xf32>, vector<16x32xf32> -> vector<16x32xf32>
    %3 = arith.negf %2 : vector<16x32xf32>
    %4 = math.exp %3 : vector<16x32xf32>
    %cst_3 = arith.constant 1.000000e+00 : f32
    %5 = vector.broadcast %cst_3 : f32 to vector<16x32xf32>
    %6 = arith.addf %5, %4 : vector<16x32xf32>
    %7 = arith.divf %5, %6 : vector<16x32xf32>
    %8 = arith.mulf %2, %7 : vector<16x32xf32>
    %cst_4 = arith.constant 1.66666663 : f32
    %9 = vector.broadcast %cst_4 : f32 to vector<16x32xf32>
    %10 = arith.mulf %8, %9 : vector<16x32xf32>
    %c0_5 = arith.constant 0 : index
    %c0_6 = arith.constant 0 : index
    %11 = vector.load %arg2[%c0_5, %c0_6] : memref<16x16xf32, #tpu.memory_space<vmem>>, vector<16x16xf32>
    %c0_7 = arith.constant 0 : index
    %c0_8 = arith.constant 0 : index
    %12 = vector.load %arg4[%c0_7, %c0_8] : memref<16x32xf32, #tpu.memory_space<vmem>>, vector<16x32xf32>
    %cst_9 = arith.constant dense<0.000000e+00> : vector<16x32xf32>
    %13 = tpu.matmul %11, %12, %cst_9 {dimension_numbers = #tpu.dot_dimension_numbers<[1], [0], [0], [1], [0, 0, 1, 1], [], []>} : vector<16x16xf32>, vector<16x32xf32>, vector<16x32xf32> -> vector<16x32xf32>
    %14 = arith.mulf %10, %13 : vector<16x32xf32>
    %c0_10 = arith.constant 0 : index
    %c0_11 = arith.constant 0 : index
    %15 = vector.load %arg5[%c0_10, %c0_11] : memref<32x16xf32, #tpu.memory_space<vmem>>, vector<32x16xf32>
    %cst_12 = arith.constant dense<0.000000e+00> : vector<16x16xf32>
    %16 = tpu.matmul %14, %15, %cst_12 {dimension_numbers = #tpu.dot_dimension_numbers<[1], [0], [0], [1], [0, 0, 1, 1], [], []>} : vector<16x32xf32>, vector<32x16xf32>, vector<16x16xf32> -> vector<16x16xf32>
    %17 = arith.negf %16 : vector<16x16xf32>
    %18 = math.exp %17 : vector<16x16xf32>
    %cst_13 = arith.constant 1.000000e+00 : f32
    %19 = vector.broadcast %cst_13 : f32 to vector<16x16xf32>
    %20 = arith.addf %19, %18 : vector<16x16xf32>
    %21 = arith.divf %19, %20 : vector<16x16xf32>
    %22 = arith.mulf %16, %21 : vector<16x16xf32>
    %cst_14 = arith.constant 1.66666663 : f32
    %23 = vector.broadcast %cst_14 : f32 to vector<16x16xf32>
    %24 = arith.mulf %22, %23 : vector<16x16xf32>
    %c0_15 = arith.constant 0 : index
    %c0_16 = arith.constant 0 : index
    %25 = vector.load %arg6[%c0_15, %c0_16] : memref<16x16xf32, #tpu.memory_space<vmem>>, vector<16x16xf32>
    tpu.vector_store %arg6[%c0_15, %c0_16], %24 {strides = array<i32>} : memref<16x16xf32, #tpu.memory_space<vmem>>, vector<16x16xf32>,
    return
  }
  func.func @transform_0(%arg0: i32) -> (i32, i32) {
    %c0_i32 = arith.constant 0 : i32
    %c0_i32_0 = arith.constant 0 : i32
    return %arg0, %c0_i32 : i32, i32
  }
  func.func @transform_1(%arg0: i32) -> (i32, i32) {
    %c0_i32 = arith.constant 0 : i32
    %c0_i32_0 = arith.constant 0 : i32
    return %arg0, %c0_i32 : i32, i32
  }
  func.func @transform_2(%arg0: i32) -> (i32, i32) {
    %c0_i32 = arith.constant 0 : i32
    %c0_i32_0 = arith.constant 0 : i32
    %c0_i32_1 = arith.constant 0 : i32
    return %c0_i32, %c0_i32_0 : i32, i32
  }
  func.func @transform_3(%arg0: i32) -> (i32, i32) {
    %c0_i32 = arith.constant 0 : i32
    %c0_i32_0 = arith.constant 0 : i32
    %c0_i32_1 = arith.constant 0 : i32
    return %c0_i32, %c0_i32_0 : i32, i32
  }
  func.func @transform_4(%arg0: i32) -> (i32, i32) {
    %c0_i32 = arith.constant 0 : i32
    %c0_i32_0 = arith.constant 0 : i32
    %c0_i32_1 = arith.constant 0 : i32
    return %c0_i32, %c0_i32_0 : i32, i32
  }
  func.func @transform_5(%arg0: i32) -> (i32, i32) {
    %c0_i32 = arith.constant 0 : i32
    %c0_i32_0 = arith.constant 0 : i32
    return %arg0, %c0_i32 : i32, i32
  }
}

module attributes {stable_mosaic.version = 11 : i64} {
  func.func @_bilinear_kernel_flat(%arg0: i32, %arg1: memref<16x8x8xf32, #tpu.memory_space<vmem>>, %arg2: memref<16x8x16xf32, #tpu.memory_space<vmem>>, %arg3: memref<16x8x8xf32, #tpu.memory_space<vmem>>, %arg4: memref<128x16xf32, #tpu.memory_space<vmem>>, %arg5: memref<16x16xf32, #tpu.memory_space<vmem>>) attributes {dimension_semantics = [#tpu.dimension_semantics<parallel>], iteration_bounds = array<i64: 1>, scalar_prefetch = 0 : i64, scratch_operands = 0 : i64, tpu.core_type = #tpu.core_type<tc>, window_params = [{transform_indices = @transform_0, window_bounds = array<i64: 16, 8, 8>}, {transform_indices = @transform_1, window_bounds = array<i64: 16, 8, 16>}, {transform_indices = @transform_2, window_bounds = array<i64: 16, 8, 8>}, {pipeline_mode = #tpu.pipeline_mode<synchronous>, transform_indices = @transform_3, window_bounds = array<i64: 128, 16>}, {transform_indices = @transform_4, window_bounds = array<i64: 16, 16>}]} {
    %c0 = arith.constant 0 : index
    %c0_0 = arith.constant 0 : index
    %c0_1 = arith.constant 0 : index
    %0 = vector.load %arg1[%c0, %c0_0, %c0_1] : memref<16x8x8xf32, #tpu.memory_space<vmem>>, vector<16x8x8xf32>
    %c0_2 = arith.constant 0 : index
    %c0_3 = arith.constant 0 : index
    %c0_4 = arith.constant 0 : index
    %1 = vector.load %arg2[%c0_2, %c0_3, %c0_4] : memref<16x8x16xf32, #tpu.memory_space<vmem>>, vector<16x8x16xf32>
    "tpu.trace_start"() <{level = 10 : i32, message = "esk,ekt->est"}> : () -> ()
    %cst = arith.constant dense<0.000000e+00> : vector<16x8x16xf32>
    %2 = tpu.matmul %0, %1, %cst {dimension_numbers = #tpu.dot_dimension_numbers<[2], [1], [1], [2], [0, 0, 0, 1, 1, 2], [0], [0]>} : vector<16x8x8xf32>, vector<16x8x16xf32>, vector<16x8x16xf32> -> vector<16x8x16xf32>
    "tpu.trace_stop"() : () -> ()
    %c0_5 = arith.constant 0 : index
    %c0_6 = arith.constant 0 : index
    %c0_7 = arith.constant 0 : index
    %3 = vector.load %arg3[%c0_5, %c0_6, %c0_7] : memref<16x8x8xf32, #tpu.memory_space<vmem>>, vector<16x8x8xf32>
    "tpu.trace_start"() <{level = 10 : i32, message = "ecs,est->ect"}> : () -> ()
    %cst_8 = arith.constant dense<0.000000e+00> : vector<16x8x16xf32>
    %4 = tpu.matmul %3, %2, %cst_8 {dimension_numbers = #tpu.dot_dimension_numbers<[2], [1], [1], [2], [0, 0, 0, 1, 1, 2], [0], [0]>} : vector<16x8x8xf32>, vector<16x8x16xf32>, vector<16x8x16xf32> -> vector<16x8x16xf32>
    "tpu.trace_stop"() : () -> ()
    %5 = vector.shape_cast %4 : vector<16x8x16xf32> to vector<16x128xf32>
    %c0_9 = arith.constant 0 : index
    %c0_10 = arith.constant 0 : index
    %6 = vector.load %arg4[%c0_9, %c0_10] : memref<128x16xf32, #tpu.memory_space<vmem>>, vector<128x16xf32>
    %cst_11 = arith.constant dense<0.000000e+00> : vector<16x16xf32>
    %7 = tpu.matmul %5, %6, %cst_11 {dimension_numbers = #tpu.dot_dimension_numbers<[1], [0], [0], [1], [0, 0, 1, 1], [], []>} : vector<16x128xf32>, vector<128x16xf32>, vector<16x16xf32> -> vector<16x16xf32>
    %c0_12 = arith.constant 0 : index
    %c0_13 = arith.constant 0 : index
    %8 = vector.load %arg5[%c0_12, %c0_13] : memref<16x16xf32, #tpu.memory_space<vmem>>, vector<16x16xf32>
    tpu.vector_store %arg5[%c0_12, %c0_13], %7 {strides = array<i32>} : memref<16x16xf32, #tpu.memory_space<vmem>>, vector<16x16xf32>,
    return
  }
  func.func @transform_0(%arg0: i32) -> (i32, i32, i32) {
    %c0_i32 = arith.constant 0 : i32
    %c0_i32_0 = arith.constant 0 : i32
    %c0_i32_1 = arith.constant 0 : i32
    return %arg0, %c0_i32, %c0_i32_0 : i32, i32, i32
  }
  func.func @transform_1(%arg0: i32) -> (i32, i32, i32) {
    %c0_i32 = arith.constant 0 : i32
    %c0_i32_0 = arith.constant 0 : i32
    %c0_i32_1 = arith.constant 0 : i32
    return %arg0, %c0_i32, %c0_i32_0 : i32, i32, i32
  }
  func.func @transform_2(%arg0: i32) -> (i32, i32, i32) {
    %c0_i32 = arith.constant 0 : i32
    %c0_i32_0 = arith.constant 0 : i32
    %c0_i32_1 = arith.constant 0 : i32
    return %arg0, %c0_i32, %c0_i32_0 : i32, i32, i32
  }
  func.func @transform_3(%arg0: i32) -> (i32, i32) {
    %c0_i32 = arith.constant 0 : i32
    %c0_i32_0 = arith.constant 0 : i32
    %c0_i32_1 = arith.constant 0 : i32
    return %c0_i32, %c0_i32_0 : i32, i32
  }
  func.func @transform_4(%arg0: i32) -> (i32, i32) {
    %c0_i32 = arith.constant 0 : i32
    %c0_i32_0 = arith.constant 0 : i32
    return %arg0, %c0_i32 : i32, i32
  }
}

module attributes {stable_mosaic.version = 11 : i64} {
  func.func @_out_kernel(%arg0: i32, %arg1: memref<16x16xf32, #tpu.memory_space<vmem>>, %arg2: memref<16x16xf32, #tpu.memory_space<vmem>>, %arg3: memref<16x32xf32, #tpu.memory_space<vmem>>, %arg4: memref<16x32xf32, #tpu.memory_space<vmem>>, %arg5: memref<16x32xf32, #tpu.memory_space<vmem>>) attributes {dimension_semantics = [#tpu.dimension_semantics<parallel>], iteration_bounds = array<i64: 1>, scalar_prefetch = 0 : i64, scratch_operands = 0 : i64, tpu.core_type = #tpu.core_type<tc>, window_params = [{transform_indices = @transform_0, window_bounds = array<i64: 16, 16>}, {transform_indices = @transform_1, window_bounds = array<i64: 16, 16>}, {pipeline_mode = #tpu.pipeline_mode<synchronous>, transform_indices = @transform_2, window_bounds = array<i64: 16, 32>}, {pipeline_mode = #tpu.pipeline_mode<synchronous>, transform_indices = @transform_3, window_bounds = array<i64: 16, 32>}, {transform_indices = @transform_4, window_bounds = array<i64: 16, 32>}]} {
    %c0 = arith.constant 0 : index
    %c0_0 = arith.constant 0 : index
    %0 = vector.load %arg1[%c0, %c0_0] : memref<16x16xf32, #tpu.memory_space<vmem>>, vector<16x16xf32>
    %c0_1 = arith.constant 0 : index
    %c0_2 = arith.constant 0 : index
    %1 = vector.load %arg3[%c0_1, %c0_2] : memref<16x32xf32, #tpu.memory_space<vmem>>, vector<16x32xf32>
    %cst = arith.constant dense<0.000000e+00> : vector<16x32xf32>
    %2 = tpu.matmul %0, %1, %cst {dimension_numbers = #tpu.dot_dimension_numbers<[1], [0], [0], [1], [0, 0, 1, 1], [], []>} : vector<16x16xf32>, vector<16x32xf32>, vector<16x32xf32> -> vector<16x32xf32>
    %3 = arith.negf %2 : vector<16x32xf32>
    %4 = math.exp %3 : vector<16x32xf32>
    %cst_3 = arith.constant 1.000000e+00 : f32
    %5 = vector.broadcast %cst_3 : f32 to vector<16x32xf32>
    %6 = arith.addf %5, %4 : vector<16x32xf32>
    %7 = arith.divf %5, %6 : vector<16x32xf32>
    %8 = arith.mulf %2, %7 : vector<16x32xf32>
    %cst_4 = arith.constant 1.66666663 : f32
    %9 = vector.broadcast %cst_4 : f32 to vector<16x32xf32>
    %10 = arith.mulf %8, %9 : vector<16x32xf32>
    %c0_5 = arith.constant 0 : index
    %c0_6 = arith.constant 0 : index
    %11 = vector.load %arg2[%c0_5, %c0_6] : memref<16x16xf32, #tpu.memory_space<vmem>>, vector<16x16xf32>
    %c0_7 = arith.constant 0 : index
    %c0_8 = arith.constant 0 : index
    %12 = vector.load %arg4[%c0_7, %c0_8] : memref<16x32xf32, #tpu.memory_space<vmem>>, vector<16x32xf32>
    %cst_9 = arith.constant dense<0.000000e+00> : vector<16x32xf32>
    %13 = tpu.matmul %11, %12, %cst_9 {dimension_numbers = #tpu.dot_dimension_numbers<[1], [0], [0], [1], [0, 0, 1, 1], [], []>} : vector<16x16xf32>, vector<16x32xf32>, vector<16x32xf32> -> vector<16x32xf32>
    %14 = arith.negf %13 : vector<16x32xf32>
    %15 = math.exp %14 : vector<16x32xf32>
    %cst_10 = arith.constant 1.000000e+00 : f32
    %16 = vector.broadcast %cst_10 : f32 to vector<16x32xf32>
    %17 = arith.addf %16, %15 : vector<16x32xf32>
    %18 = arith.divf %16, %17 : vector<16x32xf32>
    %19 = arith.mulf %13, %18 : vector<16x32xf32>
    %cst_11 = arith.constant 1.66666663 : f32
    %20 = vector.broadcast %cst_11 : f32 to vector<16x32xf32>
    %21 = arith.mulf %19, %20 : vector<16x32xf32>
    %22 = arith.addf %10, %21 : vector<16x32xf32>
    %cst_12 = arith.constant 0.707106769 : f32
    %23 = vector.broadcast %cst_12 : f32 to vector<16x32xf32>
    %24 = arith.mulf %22, %23 : vector<16x32xf32>
    %c0_13 = arith.constant 0 : index
    %c0_14 = arith.constant 0 : index
    %25 = vector.load %arg5[%c0_13, %c0_14] : memref<16x32xf32, #tpu.memory_space<vmem>>, vector<16x32xf32>
    tpu.vector_store %arg5[%c0_13, %c0_14], %24 {strides = array<i32>} : memref<16x32xf32, #tpu.memory_space<vmem>>, vector<16x32xf32>,
    return
  }
  func.func @transform_0(%arg0: i32) -> (i32, i32) {
    %c0_i32 = arith.constant 0 : i32
    %c0_i32_0 = arith.constant 0 : i32
    return %arg0, %c0_i32 : i32, i32
  }
  func.func @transform_1(%arg0: i32) -> (i32, i32) {
    %c0_i32 = arith.constant 0 : i32
    %c0_i32_0 = arith.constant 0 : i32
    return %arg0, %c0_i32 : i32, i32
  }
  func.func @transform_2(%arg0: i32) -> (i32, i32) {
    %c0_i32 = arith.constant 0 : i32
    %c0_i32_0 = arith.constant 0 : i32
    %c0_i32_1 = arith.constant 0 : i32
    return %c0_i32, %c0_i32_0 : i32, i32
  }
  func.func @transform_3(%arg0: i32) -> (i32, i32) {
    %c0_i32 = arith.constant 0 : i32
    %c0_i32_0 = arith.constant 0 : i32
    %c0_i32_1 = arith.constant 0 : i32
    return %c0_i32, %c0_i32_0 : i32, i32
  }
  func.func @transform_4(%arg0: i32) -> (i32, i32) {
    %c0_i32 = arith.constant 0 : i32
    %c0_i32_0 = arith.constant 0 : i32
    return %arg0, %c0_i32 : i32, i32
  }
}

module attributes {stable_mosaic.version = 11 : i64} {
  func.func @_front_kernel(%arg0: i32, %arg1: memref<16x32xf32, #tpu.memory_space<vmem>>, %arg2: memref<16x16xf32, #tpu.memory_space<vmem>>, %arg3: memref<32x32xf32, #tpu.memory_space<vmem>>, %arg4: memref<16x32xf32, #tpu.memory_space<vmem>>, %arg5: memref<32x16xf32, #tpu.memory_space<vmem>>, %arg6: memref<16x16xf32, #tpu.memory_space<vmem>>) attributes {dimension_semantics = [#tpu.dimension_semantics<parallel>], iteration_bounds = array<i64: 1>, scalar_prefetch = 0 : i64, scratch_operands = 0 : i64, tpu.core_type = #tpu.core_type<tc>, window_params = [{transform_indices = @transform_0, window_bounds = array<i64: 16, 32>}, {transform_indices = @transform_1, window_bounds = array<i64: 16, 16>}, {pipeline_mode = #tpu.pipeline_mode<synchronous>, transform_indices = @transform_2, window_bounds = array<i64: 32, 32>}, {pipeline_mode = #tpu.pipeline_mode<synchronous>, transform_indices = @transform_3, window_bounds = array<i64: 16, 32>}, {pipeline_mode = #tpu.pipeline_mode<synchronous>, transform_indices = @transform_4, window_bounds = array<i64: 32, 16>}, {transform_indices = @transform_5, window_bounds = array<i64: 16, 16>}]} {
    %c0 = arith.constant 0 : index
    %c0_0 = arith.constant 0 : index
    %0 = vector.load %arg1[%c0, %c0_0] : memref<16x32xf32, #tpu.memory_space<vmem>>, vector<16x32xf32>
    %c0_1 = arith.constant 0 : index
    %c0_2 = arith.constant 0 : index
    %1 = vector.load %arg3[%c0_1, %c0_2] : memref<32x32xf32, #tpu.memory_space<vmem>>, vector<32x32xf32>
    %cst = arith.constant dense<0.000000e+00> : vector<16x32xf32>
    %2 = tpu.matmul %0, %1, %cst {dimension_numbers = #tpu.dot_dimension_numbers<[1], [0], [0], [1], [0, 0, 1, 1], [], []>} : vector<16x32xf32>, vector<32x32xf32>, vector<16x32xf32> -> vector<16x32xf32>
    %3 = arith.negf %2 : vector<16x32xf32>
    %4 = math.exp %3 : vector<16x32xf32>
    %cst_3 = arith.constant 1.000000e+00 : f32
    %5 = vector.broadcast %cst_3 : f32 to vector<16x32xf32>
    %6 = arith.addf %5, %4 : vector<16x32xf32>
    %7 = arith.divf %5, %6 : vector<16x32xf32>
    %8 = arith.mulf %2, %7 : vector<16x32xf32>
    %cst_4 = arith.constant 1.66666663 : f32
    %9 = vector.broadcast %cst_4 : f32 to vector<16x32xf32>
    %10 = arith.mulf %8, %9 : vector<16x32xf32>
    %c0_5 = arith.constant 0 : index
    %c0_6 = arith.constant 0 : index
    %11 = vector.load %arg2[%c0_5, %c0_6] : memref<16x16xf32, #tpu.memory_space<vmem>>, vector<16x16xf32>
    %c0_7 = arith.constant 0 : index
    %c0_8 = arith.constant 0 : index
    %12 = vector.load %arg4[%c0_7, %c0_8] : memref<16x32xf32, #tpu.memory_space<vmem>>, vector<16x32xf32>
    %cst_9 = arith.constant dense<0.000000e+00> : vector<16x32xf32>
    %13 = tpu.matmul %11, %12, %cst_9 {dimension_numbers = #tpu.dot_dimension_numbers<[1], [0], [0], [1], [0, 0, 1, 1], [], []>} : vector<16x16xf32>, vector<16x32xf32>, vector<16x32xf32> -> vector<16x32xf32>
    %14 = arith.mulf %10, %13 : vector<16x32xf32>
    %c0_10 = arith.constant 0 : index
    %c0_11 = arith.constant 0 : index
    %15 = vector.load %arg5[%c0_10, %c0_11] : memref<32x16xf32, #tpu.memory_space<vmem>>, vector<32x16xf32>
    %cst_12 = arith.constant dense<0.000000e+00> : vector<16x16xf32>
    %16 = tpu.matmul %14, %15, %cst_12 {dimension_numbers = #tpu.dot_dimension_numbers<[1], [0], [0], [1], [0, 0, 1, 1], [], []>} : vector<16x32xf32>, vector<32x16xf32>, vector<16x16xf32> -> vector<16x16xf32>
    %17 = arith.negf %16 : vector<16x16xf32>
    %18 = math.exp %17 : vector<16x16xf32>
    %cst_13 = arith.constant 1.000000e+00 : f32
    %19 = vector.broadcast %cst_13 : f32 to vector<16x16xf32>
    %20 = arith.addf %19, %18 : vector<16x16xf32>
    %21 = arith.divf %19, %20 : vector<16x16xf32>
    %22 = arith.mulf %16, %21 : vector<16x16xf32>
    %cst_14 = arith.constant 1.66666663 : f32
    %23 = vector.broadcast %cst_14 : f32 to vector<16x16xf32>
    %24 = arith.mulf %22, %23 : vector<16x16xf32>
    %c0_15 = arith.constant 0 : index
    %c0_16 = arith.constant 0 : index
    %25 = vector.load %arg6[%c0_15, %c0_16] : memref<16x16xf32, #tpu.memory_space<vmem>>, vector<16x16xf32>
    tpu.vector_store %arg6[%c0_15, %c0_16], %24 {strides = array<i32>} : memref<16x16xf32, #tpu.memory_space<vmem>>, vector<16x16xf32>,
    return
  }
  func.func @transform_0(%arg0: i32) -> (i32, i32) {
    %c0_i32 = arith.constant 0 : i32
    %c0_i32_0 = arith.constant 0 : i32
    return %arg0, %c0_i32 : i32, i32
  }
  func.func @transform_1(%arg0: i32) -> (i32, i32) {
    %c0_i32 = arith.constant 0 : i32
    %c0_i32_0 = arith.constant 0 : i32
    return %arg0, %c0_i32 : i32, i32
  }
  func.func @transform_2(%arg0: i32) -> (i32, i32) {
    %c0_i32 = arith.constant 0 : i32
    %c0_i32_0 = arith.constant 0 : i32
    %c0_i32_1 = arith.constant 0 : i32
    return %c0_i32, %c0_i32_0 : i32, i32
  }
  func.func @transform_3(%arg0: i32) -> (i32, i32) {
    %c0_i32 = arith.constant 0 : i32
    %c0_i32_0 = arith.constant 0 : i32
    %c0_i32_1 = arith.constant 0 : i32
    return %c0_i32, %c0_i32_0 : i32, i32
  }
  func.func @transform_4(%arg0: i32) -> (i32, i32) {
    %c0_i32 = arith.constant 0 : i32
    %c0_i32_0 = arith.constant 0 : i32
    %c0_i32_1 = arith.constant 0 : i32
    return %c0_i32, %c0_i32_0 : i32, i32
  }
  func.func @transform_5(%arg0: i32) -> (i32, i32) {
    %c0_i32 = arith.constant 0 : i32
    %c0_i32_0 = arith.constant 0 : i32
    return %arg0, %c0_i32 : i32, i32
  }
}

module attributes {stable_mosaic.version = 11 : i64} {
  func.func @_bilinear_kernel_loop(%arg0: i32, %arg1: memref<16x8x8xf32, #tpu.memory_space<vmem>>, %arg2: memref<16x8x16xf32, #tpu.memory_space<vmem>>, %arg3: memref<16x8x8xf32, #tpu.memory_space<vmem>>, %arg4: memref<8x16x16xf32, #tpu.memory_space<vmem>>, %arg5: memref<16x16xf32, #tpu.memory_space<vmem>>) attributes {dimension_semantics = [#tpu.dimension_semantics<parallel>], iteration_bounds = array<i64: 1>, scalar_prefetch = 0 : i64, scratch_operands = 0 : i64, tpu.core_type = #tpu.core_type<tc>, window_params = [{transform_indices = @transform_0, window_bounds = array<i64: 16, 8, 8>}, {transform_indices = @transform_1, window_bounds = array<i64: 16, 8, 16>}, {transform_indices = @transform_2, window_bounds = array<i64: 16, 8, 8>}, {pipeline_mode = #tpu.pipeline_mode<synchronous>, transform_indices = @transform_3, window_bounds = array<i64: 8, 16, 16>}, {transform_indices = @transform_4, window_bounds = array<i64: 16, 16>}]} {
    %c0 = arith.constant 0 : index
    %c0_0 = arith.constant 0 : index
    %c0_1 = arith.constant 0 : index
    %0 = vector.load %arg1[%c0, %c0_0, %c0_1] : memref<16x8x8xf32, #tpu.memory_space<vmem>>, vector<16x8x8xf32>
    %c0_2 = arith.constant 0 : index
    %c0_3 = arith.constant 0 : index
    %c0_4 = arith.constant 0 : index
    %1 = vector.load %arg2[%c0_2, %c0_3, %c0_4] : memref<16x8x16xf32, #tpu.memory_space<vmem>>, vector<16x8x16xf32>
    "tpu.trace_start"() <{level = 10 : i32, message = "esk,ekt->est"}> : () -> ()
    %cst = arith.constant dense<0.000000e+00> : vector<16x8x16xf32>
    %2 = tpu.matmul %0, %1, %cst {dimension_numbers = #tpu.dot_dimension_numbers<[2], [1], [1], [2], [0, 0, 0, 1, 1, 2], [0], [0]>} : vector<16x8x8xf32>, vector<16x8x16xf32>, vector<16x8x16xf32> -> vector<16x8x16xf32>
    "tpu.trace_stop"() : () -> ()
    %c0_5 = arith.constant 0 : index
    %c0_6 = arith.constant 0 : index
    %c0_7 = arith.constant 0 : index
    %3 = vector.load %arg3[%c0_5, %c0_6, %c0_7] : memref<16x8x8xf32, #tpu.memory_space<vmem>>, vector<16x8x8xf32>
    "tpu.trace_start"() <{level = 10 : i32, message = "ecs,est->ect"}> : () -> ()
    %cst_8 = arith.constant dense<0.000000e+00> : vector<16x8x16xf32>
    %4 = tpu.matmul %3, %2, %cst_8 {dimension_numbers = #tpu.dot_dimension_numbers<[2], [1], [1], [2], [0, 0, 0, 1, 1, 2], [0], [0]>} : vector<16x8x8xf32>, vector<16x8x16xf32>, vector<16x8x16xf32> -> vector<16x8x16xf32>
    %cst_9 = arith.constant 0.000000e+00 : f32
    "tpu.trace_stop"() : () -> ()
    %5 = vector.broadcast %cst_9 : f32 to vector<16x16xf32>
    %6 = vector.extract_strided_slice %4 {offsets = [0, 0, 0], sizes = [16, 1, 16], strides = [1, 1, 1]} : vector<16x8x16xf32> to vector<16x1x16xf32>
    %7 = vector.shape_cast %6 : vector<16x1x16xf32> to vector<16x16xf32>
    %c0_10 = arith.constant 0 : index
    %c0_11 = arith.constant 0 : index
    %c0_12 = arith.constant 0 : index
    %8 = vector.load %arg4[%c0_10, %c0_11, %c0_12] : memref<8x16x16xf32, #tpu.memory_space<vmem>>, vector<1x16x16xf32>
    %9 = vector.shape_cast %8 : vector<1x16x16xf32> to vector<16x16xf32>
    %cst_13 = arith.constant dense<0.000000e+00> : vector<16x16xf32>
    %10 = tpu.matmul %7, %9, %cst_13 {dimension_numbers = #tpu.dot_dimension_numbers<[1], [0], [0], [1], [0, 0, 1, 1], [], []>} : vector<16x16xf32>, vector<16x16xf32>, vector<16x16xf32> -> vector<16x16xf32>
    %11 = arith.addf %5, %10 : vector<16x16xf32>
    %12 = vector.extract_strided_slice %4 {offsets = [0, 1, 0], sizes = [16, 1, 16], strides = [1, 1, 1]} : vector<16x8x16xf32> to vector<16x1x16xf32>
    %13 = vector.shape_cast %12 : vector<16x1x16xf32> to vector<16x16xf32>
    %c1 = arith.constant 1 : index
    %c0_14 = arith.constant 0 : index
    %c0_15 = arith.constant 0 : index
    %14 = vector.load %arg4[%c1, %c0_14, %c0_15] : memref<8x16x16xf32, #tpu.memory_space<vmem>>, vector<1x16x16xf32>
    %15 = vector.shape_cast %14 : vector<1x16x16xf32> to vector<16x16xf32>
    %cst_16 = arith.constant dense<0.000000e+00> : vector<16x16xf32>
    %16 = tpu.matmul %13, %15, %cst_16 {dimension_numbers = #tpu.dot_dimension_numbers<[1], [0], [0], [1], [0, 0, 1, 1], [], []>} : vector<16x16xf32>, vector<16x16xf32>, vector<16x16xf32> -> vector<16x16xf32>
    %17 = arith.addf %11, %16 : vector<16x16xf32>
    %18 = vector.extract_strided_slice %4 {offsets = [0, 2, 0], sizes = [16, 1, 16], strides = [1, 1, 1]} : vector<16x8x16xf32> to vector<16x1x16xf32>
    %19 = vector.shape_cast %18 : vector<16x1x16xf32> to vector<16x16xf32>
    %c2 = arith.constant 2 : index
    %c0_17 = arith.constant 0 : index
    %c0_18 = arith.constant 0 : index
    %20 = vector.load %arg4[%c2, %c0_17, %c0_18] : memref<8x16x16xf32, #tpu.memory_space<vmem>>, vector<1x16x16xf32>
    %21 = vector.shape_cast %20 : vector<1x16x16xf32> to vector<16x16xf32>
    %cst_19 = arith.constant dense<0.000000e+00> : vector<16x16xf32>
    %22 = tpu.matmul %19, %21, %cst_19 {dimension_numbers = #tpu.dot_dimension_numbers<[1], [0], [0], [1], [0, 0, 1, 1], [], []>} : vector<16x16xf32>, vector<16x16xf32>, vector<16x16xf32> -> vector<16x16xf32>
    %23 = arith.addf %17, %22 : vector<16x16xf32>
    %24 = vector.extract_strided_slice %4 {offsets = [0, 3, 0], sizes = [16, 1, 16], strides = [1, 1, 1]} : vector<16x8x16xf32> to vector<16x1x16xf32>
    %25 = vector.shape_cast %24 : vector<16x1x16xf32> to vector<16x16xf32>
    %c3 = arith.constant 3 : index
    %c0_20 = arith.constant 0 : index
    %c0_21 = arith.constant 0 : index
    %26 = vector.load %arg4[%c3, %c0_20, %c0_21] : memref<8x16x16xf32, #tpu.memory_space<vmem>>, vector<1x16x16xf32>
    %27 = vector.shape_cast %26 : vector<1x16x16xf32> to vector<16x16xf32>
    %cst_22 = arith.constant dense<0.000000e+00> : vector<16x16xf32>
    %28 = tpu.matmul %25, %27, %cst_22 {dimension_numbers = #tpu.dot_dimension_numbers<[1], [0], [0], [1], [0, 0, 1, 1], [], []>} : vector<16x16xf32>, vector<16x16xf32>, vector<16x16xf32> -> vector<16x16xf32>
    %29 = arith.addf %23, %28 : vector<16x16xf32>
    %30 = vector.extract_strided_slice %4 {offsets = [0, 4, 0], sizes = [16, 1, 16], strides = [1, 1, 1]} : vector<16x8x16xf32> to vector<16x1x16xf32>
    %31 = vector.shape_cast %30 : vector<16x1x16xf32> to vector<16x16xf32>
    %c4 = arith.constant 4 : index
    %c0_23 = arith.constant 0 : index
    %c0_24 = arith.constant 0 : index
    %32 = vector.load %arg4[%c4, %c0_23, %c0_24] : memref<8x16x16xf32, #tpu.memory_space<vmem>>, vector<1x16x16xf32>
    %33 = vector.shape_cast %32 : vector<1x16x16xf32> to vector<16x16xf32>
    %cst_25 = arith.constant dense<0.000000e+00> : vector<16x16xf32>
    %34 = tpu.matmul %31, %33, %cst_25 {dimension_numbers = #tpu.dot_dimension_numbers<[1], [0], [0], [1], [0, 0, 1, 1], [], []>} : vector<16x16xf32>, vector<16x16xf32>, vector<16x16xf32> -> vector<16x16xf32>
    %35 = arith.addf %29, %34 : vector<16x16xf32>
    %36 = vector.extract_strided_slice %4 {offsets = [0, 5, 0], sizes = [16, 1, 16], strides = [1, 1, 1]} : vector<16x8x16xf32> to vector<16x1x16xf32>
    %37 = vector.shape_cast %36 : vector<16x1x16xf32> to vector<16x16xf32>
    %c5 = arith.constant 5 : index
    %c0_26 = arith.constant 0 : index
    %c0_27 = arith.constant 0 : index
    %38 = vector.load %arg4[%c5, %c0_26, %c0_27] : memref<8x16x16xf32, #tpu.memory_space<vmem>>, vector<1x16x16xf32>
    %39 = vector.shape_cast %38 : vector<1x16x16xf32> to vector<16x16xf32>
    %cst_28 = arith.constant dense<0.000000e+00> : vector<16x16xf32>
    %40 = tpu.matmul %37, %39, %cst_28 {dimension_numbers = #tpu.dot_dimension_numbers<[1], [0], [0], [1], [0, 0, 1, 1], [], []>} : vector<16x16xf32>, vector<16x16xf32>, vector<16x16xf32> -> vector<16x16xf32>
    %41 = arith.addf %35, %40 : vector<16x16xf32>
    %42 = vector.extract_strided_slice %4 {offsets = [0, 6, 0], sizes = [16, 1, 16], strides = [1, 1, 1]} : vector<16x8x16xf32> to vector<16x1x16xf32>
    %43 = vector.shape_cast %42 : vector<16x1x16xf32> to vector<16x16xf32>
    %c6 = arith.constant 6 : index
    %c0_29 = arith.constant 0 : index
    %c0_30 = arith.constant 0 : index
    %44 = vector.load %arg4[%c6, %c0_29, %c0_30] : memref<8x16x16xf32, #tpu.memory_space<vmem>>, vector<1x16x16xf32>
    %45 = vector.shape_cast %44 : vector<1x16x16xf32> to vector<16x16xf32>
    %cst_31 = arith.constant dense<0.000000e+00> : vector<16x16xf32>
    %46 = tpu.matmul %43, %45, %cst_31 {dimension_numbers = #tpu.dot_dimension_numbers<[1], [0], [0], [1], [0, 0, 1, 1], [], []>} : vector<16x16xf32>, vector<16x16xf32>, vector<16x16xf32> -> vector<16x16xf32>
    %47 = arith.addf %41, %46 : vector<16x16xf32>
    %48 = vector.extract_strided_slice %4 {offsets = [0, 7, 0], sizes = [16, 1, 16], strides = [1, 1, 1]} : vector<16x8x16xf32> to vector<16x1x16xf32>
    %49 = vector.shape_cast %48 : vector<16x1x16xf32> to vector<16x16xf32>
    %c7 = arith.constant 7 : index
    %c0_32 = arith.constant 0 : index
    %c0_33 = arith.constant 0 : index
    %50 = vector.load %arg4[%c7, %c0_32, %c0_33] : memref<8x16x16xf32, #tpu.memory_space<vmem>>, vector<1x16x16xf32>
    %51 = vector.shape_cast %50 : vector<1x16x16xf32> to vector<16x16xf32>
    %cst_34 = arith.constant dense<0.000000e+00> : vector<16x16xf32>
    %52 = tpu.matmul %49, %51, %cst_34 {dimension_numbers = #tpu.dot_dimension_numbers<[1], [0], [0], [1], [0, 0, 1, 1], [], []>} : vector<16x16xf32>, vector<16x16xf32>, vector<16x16xf32> -> vector<16x16xf32>
    %53 = arith.addf %47, %52 : vector<16x16xf32>
    %c0_35 = arith.constant 0 : index
    %c0_36 = arith.constant 0 : index
    %54 = vector.load %arg5[%c0_35, %c0_36] : memref<16x16xf32, #tpu.memory_space<vmem>>, vector<16x16xf32>
    tpu.vector_store %arg5[%c0_35, %c0_36], %53 {strides = array<i32>} : memref<16x16xf32, #tpu.memory_space<vmem>>, vector<16x16xf32>,
    return
  }
  func.func @transform_0(%arg0: i32) -> (i32, i32, i32) {
    %c0_i32 = arith.constant 0 : i32
    %c0_i32_0 = arith.constant 0 : i32
    %c0_i32_1 = arith.constant 0 : i32
    return %arg0, %c0_i32, %c0_i32_0 : i32, i32, i32
  }
  func.func @transform_1(%arg0: i32) -> (i32, i32, i32) {
    %c0_i32 = arith.constant 0 : i32
    %c0_i32_0 = arith.constant 0 : i32
    %c0_i32_1 = arith.constant 0 : i32
    return %arg0, %c0_i32, %c0_i32_0 : i32, i32, i32
  }
  func.func @transform_2(%arg0: i32) -> (i32, i32, i32) {
    %c0_i32 = arith.constant 0 : i32
    %c0_i32_0 = arith.constant 0 : i32
    %c0_i32_1 = arith.constant 0 : i32
    return %arg0, %c0_i32, %c0_i32_0 : i32, i32, i32
  }
  func.func @transform_3(%arg0: i32) -> (i32, i32, i32) {
    %c0_i32 = arith.constant 0 : i32
    %c0_i32_0 = arith.constant 0 : i32
    %c0_i32_1 = arith.constant 0 : i32
    %c0_i32_2 = arith.constant 0 : i32
    return %c0_i32, %c0_i32_0, %c0_i32_1 : i32, i32, i32
  }
  func.func @transform_4(%arg0: i32) -> (i32, i32) {
    %c0_i32 = arith.constant 0 : i32
    %c0_i32_0 = arith.constant 0 : i32
    return %arg0, %c0_i32 : i32, i32
  }
}

module attributes {stable_mosaic.version = 11 : i64} {
  func.func @_out_kernel(%arg0: i32, %arg1: memref<16x16xf32, #tpu.memory_space<vmem>>, %arg2: memref<16x16xf32, #tpu.memory_space<vmem>>, %arg3: memref<16x32xf32, #tpu.memory_space<vmem>>, %arg4: memref<16x32xf32, #tpu.memory_space<vmem>>, %arg5: memref<16x32xf32, #tpu.memory_space<vmem>>) attributes {dimension_semantics = [#tpu.dimension_semantics<parallel>], iteration_bounds = array<i64: 1>, scalar_prefetch = 0 : i64, scratch_operands = 0 : i64, tpu.core_type = #tpu.core_type<tc>, window_params = [{transform_indices = @transform_0, window_bounds = array<i64: 16, 16>}, {transform_indices = @transform_1, window_bounds = array<i64: 16, 16>}, {pipeline_mode = #tpu.pipeline_mode<synchronous>, transform_indices = @transform_2, window_bounds = array<i64: 16, 32>}, {pipeline_mode = #tpu.pipeline_mode<synchronous>, transform_indices = @transform_3, window_bounds = array<i64: 16, 32>}, {transform_indices = @transform_4, window_bounds = array<i64: 16, 32>}]} {
    %c0 = arith.constant 0 : index
    %c0_0 = arith.constant 0 : index
    %0 = vector.load %arg1[%c0, %c0_0] : memref<16x16xf32, #tpu.memory_space<vmem>>, vector<16x16xf32>
    %c0_1 = arith.constant 0 : index
    %c0_2 = arith.constant 0 : index
    %1 = vector.load %arg3[%c0_1, %c0_2] : memref<16x32xf32, #tpu.memory_space<vmem>>, vector<16x32xf32>
    %cst = arith.constant dense<0.000000e+00> : vector<16x32xf32>
    %2 = tpu.matmul %0, %1, %cst {dimension_numbers = #tpu.dot_dimension_numbers<[1], [0], [0], [1], [0, 0, 1, 1], [], []>} : vector<16x16xf32>, vector<16x32xf32>, vector<16x32xf32> -> vector<16x32xf32>
    %3 = arith.negf %2 : vector<16x32xf32>
    %4 = math.exp %3 : vector<16x32xf32>
    %cst_3 = arith.constant 1.000000e+00 : f32
    %5 = vector.broadcast %cst_3 : f32 to vector<16x32xf32>
    %6 = arith.addf %5, %4 : vector<16x32xf32>
    %7 = arith.divf %5, %6 : vector<16x32xf32>
    %8 = arith.mulf %2, %7 : vector<16x32xf32>
    %cst_4 = arith.constant 1.66666663 : f32
    %9 = vector.broadcast %cst_4 : f32 to vector<16x32xf32>
    %10 = arith.mulf %8, %9 : vector<16x32xf32>
    %c0_5 = arith.constant 0 : index
    %c0_6 = arith.constant 0 : index
    %11 = vector.load %arg2[%c0_5, %c0_6] : memref<16x16xf32, #tpu.memory_space<vmem>>, vector<16x16xf32>
    %c0_7 = arith.constant 0 : index
    %c0_8 = arith.constant 0 : index
    %12 = vector.load %arg4[%c0_7, %c0_8] : memref<16x32xf32, #tpu.memory_space<vmem>>, vector<16x32xf32>
    %cst_9 = arith.constant dense<0.000000e+00> : vector<16x32xf32>
    %13 = tpu.matmul %11, %12, %cst_9 {dimension_numbers = #tpu.dot_dimension_numbers<[1], [0], [0], [1], [0, 0, 1, 1], [], []>} : vector<16x16xf32>, vector<16x32xf32>, vector<16x32xf32> -> vector<16x32xf32>
    %14 = arith.negf %13 : vector<16x32xf32>
    %15 = math.exp %14 : vector<16x32xf32>
    %cst_10 = arith.constant 1.000000e+00 : f32
    %16 = vector.broadcast %cst_10 : f32 to vector<16x32xf32>
    %17 = arith.addf %16, %15 : vector<16x32xf32>
    %18 = arith.divf %16, %17 : vector<16x32xf32>
    %19 = arith.mulf %13, %18 : vector<16x32xf32>
    %cst_11 = arith.constant 1.66666663 : f32
    %20 = vector.broadcast %cst_11 : f32 to vector<16x32xf32>
    %21 = arith.mulf %19, %20 : vector<16x32xf32>
    %22 = arith.addf %10, %21 : vector<16x32xf32>
    %cst_12 = arith.constant 0.707106769 : f32
    %23 = vector.broadcast %cst_12 : f32 to vector<16x32xf32>
    %24 = arith.mulf %22, %23 : vector<16x32xf32>
    %c0_13 = arith.constant 0 : index
    %c0_14 = arith.constant 0 : index
    %25 = vector.load %arg5[%c0_13, %c0_14] : memref<16x32xf32, #tpu.memory_space<vmem>>, vector<16x32xf32>
    tpu.vector_store %arg5[%c0_13, %c0_14], %24 {strides = array<i32>} : memref<16x32xf32, #tpu.memory_space<vmem>>, vector<16x32xf32>,
    return
  }
  func.func @transform_0(%arg0: i32) -> (i32, i32) {
    %c0_i32 = arith.constant 0 : i32
    %c0_i32_0 = arith.constant 0 : i32
    return %arg0, %c0_i32 : i32, i32
  }
  func.func @transform_1(%arg0: i32) -> (i32, i32) {
    %c0_i32 = arith.constant 0 : i32
    %c0_i32_0 = arith.constant 0 : i32
    return %arg0, %c0_i32 : i32, i32
  }
  func.func @transform_2(%arg0: i32) -> (i32, i32) {
    %c0_i32 = arith.constant 0 : i32
    %c0_i32_0 = arith.constant 0 : i32
    %c0_i32_1 = arith.constant 0 : i32
    return %c0_i32, %c0_i32_0 : i32, i32
  }
  func.func @transform_3(%arg0: i32) -> (i32, i32) {
    %c0_i32 = arith.constant 0 : i32
    %c0_i32_0 = arith.constant 0 : i32
    %c0_i32_1 = arith.constant 0 : i32
    return %c0_i32, %c0_i32_0 : i32, i32
  }
  func.func @transform_4(%arg0: i32) -> (i32, i32) {
    %c0_i32 = arith.constant 0 : i32
    %c0_i32_0 = arith.constant 0 : i32
    return %arg0, %c0_i32 : i32, i32
  }
}

</mosaic_0001>

<bundles_post_ra>
// kernel: triplet_interaction.3
= control target key start
LH: loop header
LB: loop body
LE: loop exit
PB: predicated region body
PF: predicated region fallthrough
CT: control target
= control target key end

     0   :  { %vm26_vm0 = vcmask 261120   ;;  %vm128_vm1 = vcmask 130048   ;;  %s476_s2 = inlined_call_operand.vmem [shape: f32[32,32], index: 2, kind: input, shape index: {}]   ;;  %s477_s0 = inlined_call_operand.vmem [shape: f32[16,32], index: 0, kind: input, shape index: {}]   ;;  %s478_s3 = inlined_call_operand.vmem [shape: f32[16,32], index: 3, kind: input, shape index: {}]   ;;  %s479_s1 = inlined_call_operand.vmem [shape: f32[16,16], index: 1, kind: input, shape index: {}]   ;;  %s480_s4 = inlined_call_operand.vmem [shape: f32[32,16], index: 4, kind: input, shape index: {}]   ;;  %s481_s5 = inlined_call_operand.vmem [shape: f32[16,16], index: 5, kind: output, shape index: {}]  }
   0x1   :  { %v25_v0 = vld [vmem:[%s476_s2 + $0x18] sm:$0xff]  ;;  %v24_v1 = vld [vmem:[%s476_s2 + $0x10] sm:$0xff]  ;;  %v20_v2 = vld [vmem:[%s477_s0] sm:$0xff] }
   0x2   :  { %345 = vmatprep.subr.mxu0 %v25_v0  ;;  %v23_v3 = vld [vmem:[%s476_s2 + $0x8] sm:$0xff]  ;;  %353 = vmatprep.mubr.msk.f32.mxu0 %vm26_vm0, %v20_v2  ;;  %v126_v5 = vld [vmem:[%s478_s3] sm:$0xff]  ;;  %v215_v10 = vld [vmem:[%s480_s4 + $0x18] sm:$0xff] }
   0x3   :  { %346 = vmatpush3.msra.mxu0 %v25_v0  ;;  %v127_v4 = vld [vmem:[%s478_s3 + $0x8] sm:$0xff]  ;;  %v22_v6 = vld [vmem:[%s476_s2] sm:$0xff]  ;;  %v214_v11 = vld [vmem:[%s480_s4 + $0x10] sm:$0xff] }
   0x4   :  { %347 = vmatprep.subr.mxu0 %v24_v1  ;;  %356 = vmatprep.subr.mxu1 %v127_v4  ;;  %v124_v7 = vld [vmem:[%s479_s1] sm:$0xff]  ;;  %v125_v8 = vld [vmem:[%s479_s1 + $0x8] sm:$0xff] }
   0x5   :  { %348 = vmatpush3.msra.mxu0 %v24_v1  ;;  %357 = vmatpush3.msra.mxu1 %v127_v4  ;;  %v21_v9 = vld [vmem:[%s477_s0 + $0x8] sm:$0xff]  ;;  %v212_v13 = vld [vmem:[%s480_s4] sm:$0xff] }
   0x6   :  { %349 = vmatprep.subr.mxu0 %v23_v3  ;;  %358 = vmatprep.subr.mxu1 %v126_v5  ;;  %v213_v12 = vld [vmem:[%s480_s4 + $0x8] sm:$0xff] }
   0x7   :  { %350 = vmatpush3.msra.mxu0 %v23_v3  ;;  %359 = vmatpush3.msra.mxu1 %v126_v5 }
   0x8   :  { %351 = vmatprep.subr.mxu0 %v22_v6  ;;  %360 = vmatprep.mubr.msk.f32.mxu1 %vm128_vm1, %v124_v7 }
   0x9   :  { %352 = vmatpush3.msra.mxu0 %v22_v6  ;;  %361 = vmatmul.mubr.msk.f32.vlgmr.msra.gmra.mxu1 %vm128_vm1, %v125_v8 }
   0xa   :  { %354 = vmatmul.mubr.msk.f32.vlgmr.msra.gmra.mxu0 %vm26_vm0, %v21_v9  ;;  %363 = vmatprep.subr.mxu1 %v215_v10 }
   0xb   :  { %364 = vmatpush3.msra.mxu1 %v215_v10 }
   0xc   :  { %365 = vmatprep.subr.mxu1 %v214_v11 }
   0xd   :  { %366 = vmatpush3.msra.mxu1 %v214_v11 }
   0xe   :  { %367 = vmatprep.subr.mxu1 %v213_v12 }
   0xf   :  { %368 = vmatpush3.msra.mxu1 %v213_v12 }
  0x10   :  { %369 = vmatprep.subr.mxu1 %v212_v13 }
  0x11   :  { %370 = vmatpush3.msra.mxu1 %v212_v13 }
  0xc9   :  { %v362_v25 = vpop.f32.mrf.mxu1 }
  0xca   :  { %v355_v14 = vpop.f32.mrf.mxu0 }
  0xcb   :  { %v322_v15 = vmul.f32 -1.442695, %v355_v14  ;;  %v201_v29 = vpop.f32.mrf.mxu1 }
  0xcc   :  { %v99_v16 = vpop.f32.mrf.mxu0 }
  0xcd   :  { %374 = vpow2.f32 %v322_v15  ;;  %v321_v17 = vmul.f32 -1.442695, %v99_v16 }
  0xcf   :  { %376 = vpow2.f32 %v321_v17 }
  0xda   :  { %v375_v18 = vpop.eup %374 }
  0xdb   :  { %v115_v19 = vadd.f32 1.0, %v375_v18 }
  0xdc   :  { %v377_v20 = vpop.eup %376 }
  0xdd   :  { %378 = vrcp.f32 %v115_v19  ;;  %v114_v21 = vadd.f32 1.0, %v377_v20 }
  0xdf   :  { %380 = vrcp.f32 %v114_v21 }
  0xea   :  { %v379_v22 = vpop.eup %378 }
  0xeb   :  { %v121_v23 = vmul.f32 %v379_v22, %v355_v14 }
  0xec   :  { %v381_v24 = vpop.eup %380 }
  0xed   :  { %v120_v26 = vmul.f32 %v381_v24, %v99_v16  ;;  %v123_v27 = vmul.f32 1.6666666, %v121_v23 }
  0xef   :  { %v122_v28 = vmul.f32 1.6666666, %v120_v26  ;;  %v211_v31 = vmul.f32 %v362_v25, %v123_v27 }
  0xf1   :  { %v210_v30 = vmul.f32 %v201_v29, %v122_v28 }
  0xf3   :  { %371 = vmatprep.mubr.msk.f32.mxu1 %vm26_vm0, %v210_v30 }
  0xf4   :  { %372 = vmatmul.mubr.msk.f32.vlgmr.msra.gmra.mxu1 %vm26_vm0, %v211_v31 }
 0x1b4   :  { %v373_v32 = vpop.f32.mrf.mxu1 }
 0x1b5   :  { %v328_v33 = vmul.f32 -1.442695, %v373_v32 }
 0x1b6   :  { %v288_v34 = vpop.f32.mrf.mxu1 }
 0x1b7   :  { %382 = vpow2.f32 %v328_v33  ;;  %v327_v35 = vmul.f32 -1.442695, %v288_v34 }
 0x1b9   :  { %384 = vpow2.f32 %v327_v35 }
 0x1c4   :  { %v383_v36 = vpop.eup %382 }
 0x1c5   :  { %v304_v37 = vadd.f32 1.0, %v383_v36 }
 0x1c6   :  { %v385_v38 = vpop.eup %384 }
 0x1c7   :  { %386 = vrcp.f32 %v304_v37  ;;  %v303_v39 = vadd.f32 1.0, %v385_v38 }
 0x1c9   :  { %388 = vrcp.f32 %v303_v39 }
 0x1d4   :  { %v387_v40 = vpop.eup %386 }
 0x1d5   :  { %v310_v41 = vmul.f32 %v387_v40, %v373_v32 }
 0x1d6   :  { %v389_v42 = vpop.eup %388 }
 0x1d7   :  { %v312_v43 = vmul.f32 1.6666666, %v310_v41  ;;  %v309_v44 = vmul.f32 %v389_v42, %v288_v34 }
 0x1d9   :  { %314 = vst.msk [vmem:[%s481_s5 + $0x8] sm:$0xff] %vm128_vm1, %v312_v43  ;;  %v311_v45 = vmul.f32 1.6666666, %v309_v44 }
 0x1db   :  { %313 = vst.msk [vmem:[%s481_s5] sm:$0xff] %vm128_vm1, %v311_v45 }

// kernel: triplet_interaction.5
= control target key start
LH: loop header
LB: loop body
LE: loop exit
PB: predicated region body
PF: predicated region fallthrough
CT: control target
= control target key end

     0   :  { %vm22_vm0 = vcmask 130048   ;;  %s370_s0 = inlined_call_operand.vmem [shape: f32[16,16], index: 0, kind: input, shape index: {}]   ;;  %s371_s1 = inlined_call_operand.vmem [shape: f32[16,16], index: 1, kind: input, shape index: {}]   ;;  %s372_s2 = inlined_call_operand.vmem [shape: f32[16,32], index: 2, kind: input, shape index: {}]   ;;  %s373_s3 = inlined_call_operand.vmem [shape: f32[16,32], index: 3, kind: input, shape index: {}]   ;;  %s374_s4 = inlined_call_operand.hbm [shape: f32[16,32], index: 4, kind: output, shape index: {}]  }
   0x1   :  { %v21_v0 = vld [vmem:[%s372_s2 + $0x8] sm:$0xff]  ;;  %v20_v2 = vld [vmem:[%s372_s2] sm:$0xff] }
   0x2   :  { %v123_v1 = vld [vmem:[%s373_s3 + $0x8] sm:$0xff]  ;;  %260 = vmatprep.subr.mxu0 %v21_v0  ;;  %v122_v3 = vld [vmem:[%s373_s3] sm:$0xff] }
   0x3   :  { %267 = vmatprep.subr.mxu1 %v123_v1  ;;  %v18_v4 = vld [vmem:[%s370_s0] sm:$0xff]  ;;  %261 = vmatpush3.msra.mxu0 %v21_v0 }
   0x4   :  { %268 = vmatpush3.msra.mxu1 %v123_v1  ;;  %v120_v5 = vld [vmem:[%s371_s1] sm:$0xff] }
   0x5   :  { %9 = vsyncpa [#allocation3], 0  ;;  %262 = vmatprep.subr.mxu0 %v20_v2  ;;  %269 = vmatprep.subr.mxu1 %v122_v3  ;;  %v19_v6 = vld [vmem:[%s370_s0 + $0x8] sm:$0xff]  ;;  %s315_s0 = smov [#allocation2]   ;;  %vm225_vm1 = vcmask 261120  }
   0x6   :  { %v121_v7 = vld [vmem:[%s371_s1 + $0x8] sm:$0xff]  ;;  %263 = vmatpush3.msra.mxu0 %v20_v2  ;;  %264 = vmatprep.mubr.msk.f32.mxu0 %vm22_vm0, %v18_v4  ;;  %s233_s1 = sshll.u32 %s315_s0, 4  ;;  %s234_s1 = int_to_ptr.vmem [resolvable:$true] %s233_s1 }
   0x7   :  { %270 = vmatpush3.msra.mxu1 %v122_v3  ;;  %271 = vmatprep.mubr.msk.f32.mxu1 %vm22_vm0, %v120_v5  ;;  %s293_s29 = scalar_lea.vmem %s234_s1, 256  ;;  %p298_p1 = scmp.lt.s32.totalorder %s234_s1, %s234_s1 }
   0x8   :  { %265 = vmatmul.mubr.msk.f32.vlgmr.msra.gmra.mxu0 %vm22_vm0, %v19_v6  ;;  %272 = vmatmul.mubr.msk.f32.vlgmr.msra.gmra.mxu1 %vm22_vm0, %v121_v7  ;;  %p294_p0 = scmp.ne.s32.totalorder %s234_s1, %s293_s29  ;;  %p299_p2 = scmp.lt.s32.totalorder %s293_s29, %s293_s29 }
   0xa   :  { %p300_p3 = por %p299_p2, %p298_p1 }
   0xc   :  { %p301_p4 = pnand %p300_p3, %p294_p0 }
  0xc8   :  { %v266_v8 = vpop.f32.mrf.mxu0  ;;  %v273_v9 = vpop.f32.mrf.mxu1 }
  0xc9   :  { %v247_v10 = vmul.f32 -1.442695, %v266_v8  ;;  %v251_v11 = vmul.f32 -1.442695, %v273_v9 }
  0xca   :  { %v95_v12 = vpop.f32.mrf.mxu0  ;;  %v196_v13 = vpop.f32.mrf.mxu1 }
  0xcb   :  { %277 = vpow2.f32 %v247_v10  ;;  %v246_v14 = vmul.f32 -1.442695, %v95_v12  ;;  %v250_v15 = vmul.f32 -1.442695, %v196_v13 }
  0xcc   :  { %279 = vpow2.f32 %v251_v11 }
  0xcd   :  { %281 = vpow2.f32 %v246_v14 }
  0xce   :  { %283 = vpow2.f32 %v250_v15 }
  0xd8   :  { %v278_v16 = vpop.eup %277 }
  0xd9   :  { %v280_v17 = vpop.eup %279  ;;  %v111_v18 = vadd.f32 1.0, %v278_v16 }
  0xda   :  { %v282_v19 = vpop.eup %281  ;;  %v212_v20 = vadd.f32 1.0, %v280_v17 }
  0xdb   :  { %v284_v21 = vpop.eup %283  ;;  %285 = vrcp.f32 %v111_v18  ;;  %v110_v22 = vadd.f32 1.0, %v282_v19 }
  0xdc   :  { %287 = vrcp.f32 %v212_v20  ;;  %v211_v23 = vadd.f32 1.0, %v284_v21 }
  0xdd   :  { %289 = vrcp.f32 %v110_v22 }
  0xde   :  { %291 = vrcp.f32 %v211_v23 }
  0xe8   :  { %v286_v24 = vpop.eup %285 }
  0xe9   :  { %v288_v25 = vpop.eup %287  ;;  %v117_v26 = vmul.f32 %v286_v24, %v266_v8 }
  0xea   :  { %v290_v27 = vpop.eup %289  ;;  %v218_v28 = vmul.f32 %v288_v25, %v273_v9 }
  0xeb   :  { %v292_v29 = vpop.eup %291  ;;  %v119_v30 = vmul.f32 1.6666666, %v117_v26  ;;  %v116_v31 = vmul.f32 %v290_v27, %v95_v12 }
  0xec   :  { %v220_v32 = vmul.f32 1.6666666, %v218_v28  ;;  %v217_v33 = vmul.f32 %v292_v29, %v196_v13 }
  0xed   :  { %v118_v34 = vmul.f32 1.6666666, %v116_v31 }
  0xee   :  { %v222_v35 = vadd.f32 %v220_v32, %v119_v30  ;;  %v219_v36 = vmul.f32 1.6666666, %v217_v33 }
  0xf0   :  { %v224_v37 = vmul.f32 0.70710677, %v222_v35  ;;  %v221_v38 = vadd.f32 %v219_v36, %v118_v34 }
  0xf2   :  { %v223_v39 = vmul.f32 0.70710677, %v221_v38  ;;  %227 = vst.msk [vmem:[#allocation2 + $0x8] sm:$0xff] %vm225_vm1, %v224_v37 }
  0xf4   :  { %226 = vst.msk [vmem:[#allocation2] sm:$0xff] %vm225_vm1, %v223_v39 }
  0xf5   :  { %304 = shalt.err (!%p301_p4)
}
  0xf6   :  { %s316_s30 = smov 128   ;;  %s317_s5 = smov 8  }
  0xf7   :  { %239 = dma.vmem_to_hbm [thread:$0]  %s234_s1, 256, %s374_s4, [#allocation3], %s316_s30, %s316_s30, %s317_s5  }
  0xf8   :  { %313 = dma.done.wait [#allocation3], 256  }
  0xf9   :  { %314 = vsyncadd [#allocation3], 4294967040 }
  0xfa   :  { %243 = vsyncpa [#allocation3], 1 }

// kernel: triplet_interaction.4
= control target key start
LH: loop header
LB: loop body
LE: loop exit
PB: predicated region body
PF: predicated region fallthrough
CT: control target
= control target key end

     0   :  { %vm49_vm0 = vcmask 64512   ;;  %v3203_v0 = vmov 0.0   ;;  %vm3204_vm1 = vmmov 0   ;;  %s3207_s30 = smov 48   ;;  %s3208_s5 = smov 16   ;;  %vm2730_vm2 = vcmask 130048   ;;  %s3655_s1 = inlined_call_operand.vmem [shape: f32[16,8,16], index: 1, kind: input, shape index: {}]   ;;  %s3656_s0 = inlined_call_operand.vmem [shape: f32[16,8,8], index: 0, kind: input, shape index: {}]   ;;  %s3657_s2 = inlined_call_operand.vmem [shape: f32[16,8,8], index: 2, kind: input, shape index: {}]   ;;  %s3658_s3 = inlined_call_operand.vmem [shape: f32[128,16], index: 3, kind: input, shape index: {}]   ;;  %s3659_s4 = inlined_call_operand.vmem [shape: f32[16,16], index: 4, kind: output, shape index: {}]  }
   0x1   :  { %2962 = vmatprep.subr.mxu1 %v3203_v0  ;;  %v33_v1 = vld [vmem:[%s3655_s1] sm:$0xff]  ;;  %2964 = vmatprep.mubr.msk.f32.mxu1 %vm3204_vm1, %v3203_v0  ;;  %v34_v3 = vld [vmem:[%s3655_s1 + $0x8] sm:$0xff]  ;;  %v35_v5 = vld [vmem:[%s3655_s1 + $0x10] sm:$0xff]  ;;  %s3209_s8 = smov 64   ;;  %s3211_s9 = smov 96   ;;  %vm2733_vm3 = vcmask 261120  }
   0x2   :  { %v17_v2 = vld [vmem:[%s3656_s0] sm:$0xff]  ;;  %2963 = vmatpush3.msra.mxu1 %v33_v1  ;;  %3002 = vmatprep.subr.mxu0 %v3203_v0  ;;  %v18_v4 = vld [vmem:[%s3656_s0 + $0x8] sm:$0xff]  ;;  %v19_v8 = vld [vmem:[%s3656_s0 + $0x10] sm:$0xff]  ;;  %s3212_s10 = smov 80   ;;  %s3213_s11 = smov 112   ;;  %vm2736_vm4 = vcmask 392192  }
   0x3   :  { %2965 = vmatmul.mubr.msk.f32.vlgmr.msra.gmra.mxu1 %vm49_vm0, %v17_v2  ;;  %2967 = vmatprep.subr.mxu1 %v3203_v0  ;;  %v41_v6 = vld [vmem:[%s3655_s1 + $0x40] sm:$0xff]  ;;  %v43_v9 = vld [vmem:[%s3655_s1 + $0x50] sm:$0xff]  ;;  %v36_v10 = vld [vmem:[%s3655_s1 + $0x18] sm:$0xff]  ;;  %vm2739_vm5 = vcmask 523264   ;;  %vm2742_vm6 = vcmask 654336   ;;  %vm2745_vm7 = vcmask 785408  }
   0x4   :  { %2968 = vmatpush3.msra.mxu1 %v34_v3  ;;  %2969 = vmatprep.mubr.msk.f32.mxu1 %vm3204_vm1, %v3203_v0  ;;  %v25_v7 = vld [vmem:[%s3656_s0 + $0x40] sm:$0xff]  ;;  %v27_v11 = vld [vmem:[%s3656_s0 + $0x50] sm:$0xff]  ;;  %v20_v12 = vld [vmem:[%s3656_s0 + $0x18] sm:$0xff]  ;;  %vm2748_vm8 = vcmask 916480  }
   0x5   :  { %2972 = vmatprep.subr.mxu1 %v3203_v0  ;;  %3004 = vmatprep.mubr.msk.f32.mxu0 %vm3204_vm1, %v3203_v0  ;;  %v45_v13 = vld [vmem:[%s3655_s1 + $0x60] sm:$0xff]  ;;  %v47_v17 = vld [vmem:[%s3655_s1 + $0x70] sm:$0xff]  ;;  %v38_v18 = vld [vmem:[%s3655_s1 + $0x28] sm:$0xff] }
   0x6   :  { %3003 = vmatpush3.msra.mxu0 %v41_v6  ;;  %v37_v14 = vld [vmem:[%s3655_s1 + $0x20] sm:$0xff]  ;;  %v31_v19 = vld [vmem:[%s3656_s0 + $0x70] sm:$0xff]  ;;  %v22_v20 = vld [vmem:[%s3656_s0 + $0x28] sm:$0xff] }
   0x7   :  { %2970 = vmatmul.mubr.msk.f32.vlgmr.msra.gmra.mxu1 %vm49_vm0, %v18_v4  ;;  %3005 = vmatmul.mubr.msk.f32.vlgmr.msra.gmra.mxu0 %vm49_vm0, %v25_v7  ;;  %v29_v15 = vld [vmem:[%s3656_s0 + $0x60] sm:$0xff]  ;;  %v39_v21 = vld [vmem:[%s3655_s1 + $0x30] sm:$0xff]  ;;  %v40_v23 = vld [vmem:[%s3655_s1 + $0x38] sm:$0xff] }
   0x8   :  { %2973 = vmatpush3.msra.mxu1 %v35_v5  ;;  %2974 = vmatprep.mubr.msk.f32.mxu1 %vm3204_vm1, %v3203_v0  ;;  %v21_v16 = vld [vmem:[%s3656_s0 + $0x20] sm:$0xff]  ;;  %v23_v22 = vld [vmem:[%s3656_s0 + $0x30] sm:$0xff]  ;;  %v24_v24 = vld [vmem:[%s3656_s0 + $0x38] sm:$0xff] }
   0x9   :  { %2977 = vmatprep.subr.mxu1 %v3203_v0  ;;  %3012 = vmatprep.subr.mxu0 %v3203_v0  ;;  %v42_v25 = vld [vmem:[%s3655_s1 + $0x48] sm:$0xff]  ;;  %v44_v27 = vld [vmem:[%s3655_s1 + $0x58] sm:$0xff]  ;;  %v1218_v33 = vld [vmem:[%s3657_s2] sm:$0xff] }
   0xa   :  { %3014 = vmatprep.mubr.msk.f32.mxu0 %vm3204_vm1, %v3203_v0  ;;  %3013 = vmatpush3.msra.mxu0 %v43_v9  ;;  %v26_v26 = vld [vmem:[%s3656_s0 + $0x48] sm:$0xff]  ;;  %v28_v28 = vld [vmem:[%s3656_s0 + $0x58] sm:$0xff]  ;;  %v1220_v40 = vld [vmem:[%s3657_s2 + $0x10] sm:$0xff] }
   0xb   :  { %2975 = vmatmul.mubr.msk.f32.vlgmr.msra.gmra.mxu1 %vm49_vm0, %v19_v8  ;;  %3015 = vmatmul.mubr.msk.f32.vlgmr.msra.gmra.mxu0 %vm49_vm0, %v27_v11  ;;  %v46_v29 = vld [vmem:[%s3655_s1 + $0x68] sm:$0xff]  ;;  %v48_v31 = vld [vmem:[%s3655_s1 + $0x78] sm:$0xff]  ;;  %v1222_v50 = vld [vmem:[%s3657_s2 + $0x20] sm:$0xff] }
   0xc   :  { %2978 = vmatpush3.msra.mxu1 %v36_v10  ;;  %2979 = vmatprep.mubr.msk.f32.mxu1 %vm3204_vm1, %v3203_v0  ;;  %v30_v30 = vld [vmem:[%s3656_s0 + $0x68] sm:$0xff]  ;;  %v32_v32 = vld [vmem:[%s3656_s0 + $0x78] sm:$0xff]  ;;  %v1224_v59 = vld [vmem:[%s3657_s2 + $0x30] sm:$0xff] }
   0xd   :  { %2982 = vmatprep.subr.mxu1 %v3203_v0  ;;  %3022 = vmatprep.subr.mxu0 %v3203_v0  ;;  %v1219_v36 = vld [vmem:[%s3657_s2 + $0x8] sm:$0xff]  ;;  %v1221_v45 = vld [vmem:[%s3657_s2 + $0x18] sm:$0xff]  ;;  %v1226_v1 = vld [vmem:[%s3657_s2 + $0x40] sm:$0xff] }
   0xe   :  { %3024 = vmatprep.mubr.msk.f32.mxu0 %vm3204_vm1, %v3203_v0  ;;  %3023 = vmatpush3.msra.mxu0 %v45_v13  ;;  %v1223_v55 = vld [vmem:[%s3657_s2 + $0x28] sm:$0xff]  ;;  %v1225_v62 = vld [vmem:[%s3657_s2 + $0x38] sm:$0xff]  ;;  %v1228_v5 = vld [vmem:[%s3657_s2 + $0x50] sm:$0xff] }
   0xf   :  { %2980 = vmatmul.mubr.msk.f32.vlgmr.msra.gmra.mxu1 %vm49_vm0, %v20_v12  ;;  %3025 = vmatmul.mubr.msk.f32.vlgmr.msra.gmra.mxu0 %vm49_vm0, %v29_v15  ;;  %v1227_v3 = vld [vmem:[%s3657_s2 + $0x48] sm:$0xff]  ;;  %v1229_v7 = vld [vmem:[%s3657_s2 + $0x58] sm:$0xff]  ;;  %v1230_v9 = vld [vmem:[%s3657_s2 + $0x60] sm:$0xff] }
  0x10   :  { %2983 = vmatpush3.msra.mxu1 %v37_v14  ;;  %2984 = vmatprep.mubr.msk.f32.mxu1 %vm3204_vm1, %v3203_v0  ;;  %v1231_v11 = vld [vmem:[%s3657_s2 + $0x68] sm:$0xff]  ;;  %v1232_v13 = vld [vmem:[%s3657_s2 + $0x70] sm:$0xff]  ;;  %v1233_v15 = vld [vmem:[%s3657_s2 + $0x78] sm:$0xff]  ;;  %s3210_s2 = smov 32  }
  0x11   :  { %2987 = vmatprep.subr.mxu1 %v3203_v0  ;;  %3032 = vmatprep.subr.mxu0 %v3203_v0 }
  0x12   :  { %3034 = vmatprep.mubr.msk.f32.mxu0 %vm3204_vm1, %v3203_v0  ;;  %3033 = vmatpush3.msra.mxu0 %v47_v17 }
  0x13   :  { %2985 = vmatmul.mubr.msk.f32.vlgmr.msra.gmra.mxu1 %vm49_vm0, %v21_v16  ;;  %3035 = vmatmul.mubr.msk.f32.vlgmr.msra.gmra.mxu0 %vm49_vm0, %v31_v19  ;;  %v2765_v19 = vld [vmem:[%s3658_s3 + $0x70] sm:$0xff] }
  0x14   :  { %2988 = vmatpush3.msra.mxu1 %v38_v18  ;;  %2989 = vmatprep.mubr.msk.f32.mxu1 %vm3204_vm1, %v3203_v0  ;;  %v2766_v18 = vld [vmem:[%s3658_s3 + $0x78] sm:$0xff] }
  0x15   :  { %2992 = vmatprep.subr.mxu1 %v3203_v0  ;;  %3042 = vmatprep.subr.mxu0 %v3203_v0 }
  0x16   :  { %3044 = vmatprep.mubr.msk.f32.mxu0 %vm3204_vm1, %v3203_v0 }
  0x17   :  { %2990 = vmatmul.mubr.msk.f32.vlgmr.msra.gmra.mxu1 %vm49_vm0, %v22_v20  ;;  %v2763_v20 = vld [vmem:[%s3658_s3 + $0x60] sm:$0xff] }
  0x18   :  { %2993 = vmatpush3.msra.mxu1 %v39_v21  ;;  %2994 = vmatprep.mubr.msk.f32.mxu1 %vm3204_vm1, %v3203_v0  ;;  %v2762_v21 = vld [vmem:[%s3658_s3 + $0x58] sm:$0xff] }
  0x19   :  { %2997 = vmatprep.subr.mxu1 %v3203_v0 }
  0x1b   :  { %2995 = vmatmul.mubr.msk.f32.vlgmr.msra.gmra.mxu1 %vm49_vm0, %v23_v22  ;;  %v2761_v22 = vld [vmem:[%s3658_s3 + $0x50] sm:$0xff] }
  0x1c   :  { %2998 = vmatpush3.msra.mxu1 %v40_v23  ;;  %2999 = vmatprep.mubr.msk.f32.mxu1 %vm3204_vm1, %v3203_v0  ;;  %v2760_v23 = vld [vmem:[%s3658_s3 + $0x48] sm:$0xff] }
  0x1d   :  { %3007 = vmatprep.subr.mxu1 %v3203_v0 }
  0x1f   :  { %3000 = vmatmul.mubr.msk.f32.vlgmr.msra.gmra.mxu1 %vm49_vm0, %v24_v24  ;;  %v2759_v24 = vld [vmem:[%s3658_s3 + $0x40] sm:$0xff] }
  0x20   :  { %3008 = vmatpush3.msra.mxu1 %v42_v25  ;;  %3009 = vmatprep.mubr.msk.f32.mxu1 %vm3204_vm1, %v3203_v0 }
  0x21   :  { %3017 = vmatprep.subr.mxu1 %v3203_v0 }
  0x23   :  { %3010 = vmatmul.mubr.msk.f32.vlgmr.msra.gmra.mxu1 %vm49_vm0, %v26_v26 }
  0x24   :  { %3018 = vmatpush3.msra.mxu1 %v44_v27  ;;  %3019 = vmatprep.mubr.msk.f32.mxu1 %vm3204_vm1, %v3203_v0 }
  0x25   :  { %3027 = vmatprep.subr.mxu1 %v3203_v0 }
  0x27   :  { %3020 = vmatmul.mubr.msk.f32.vlgmr.msra.gmra.mxu1 %vm49_vm0, %v28_v28 }
  0x28   :  { %3028 = vmatpush3.msra.mxu1 %v46_v29  ;;  %3029 = vmatprep.mubr.msk.f32.mxu1 %vm3204_vm1, %v3203_v0 }
  0x29   :  { %3037 = vmatprep.subr.mxu1 %v3203_v0 }
  0x2b   :  { %3030 = vmatmul.mubr.msk.f32.vlgmr.msra.gmra.mxu1 %vm49_vm0, %v30_v30 }
  0x2c   :  { %3038 = vmatpush3.msra.mxu1 %v48_v31  ;;  %3039 = vmatprep.mubr.msk.f32.mxu1 %vm3204_vm1, %v3203_v0 }
  0x2d   :  { %3047 = vmatprep.subr.mxu1 %v3203_v0 }
  0x2f   :  { %3040 = vmatmul.mubr.msk.f32.vlgmr.msra.gmra.mxu1 %vm49_vm0, %v32_v32 }
  0x30   :  { %3049 = vmatprep.mubr.msk.f32.mxu1 %vm3204_vm1, %v3203_v0 }
  0xc3   :  { %v119_v34 = vpop.f32.mrf.mxu1 }
  0xc4   :  { %3043 = vmatpush3.msra.mxu0 %v119_v34 }
  0xc5   :  { %v2966_v35 = vpop.f32.mrf.mxu1  ;;  %3052 = vmatprep.subr.mxu0 %v3203_v0  ;;  %3045 = vmatmul.mubr.msk.f32.vlgmr.msra.gmra.mxu0 %vm49_vm0, %v1218_v33  ;;  %v3205_v33 = vmov 1983009808  }
  0xc6   :  { %3054 = vmatprep.mubr.msk.f32.mxu0 %vm3204_vm1, %v3203_v0  ;;  %v2405_v34 = vunpack.c.l.s4 %v3205_v33  ;;  %v2407_v35 = vlaneseq }
  0xc7   :  { %v192_v37 = vpop.f32.mrf.mxu1  ;;  %v703_v39 = vpop.f32.mrf.mxu0 }
  0xc8   :  { %3048 = vmatpush3.msra.mxu1 %v192_v37 }
  0xc9   :  { %v2971_v38 = vpop.f32.mrf.mxu1  ;;  %3057 = vmatprep.subr.mxu1 %v3203_v0  ;;  %3050 = vmatmul.mubr.msk.f32.vlgmr.msra.gmra.mxu1 %vm49_vm0, %v1219_v36  ;;  %v3006_v42 = vpop.f32.mrf.mxu0 }
  0xca   :  { %3059 = vmatprep.mubr.msk.f32.mxu1 %vm3204_vm1, %v3203_v0  ;;  %v2406_v38 = vunpack.c.0.s8 %v2405_v34 }
  0xcb   :  { %v265_v41 = vpop.f32.mrf.mxu1  ;;  %v849_v44 = vpop.f32.mrf.mxu0 }
  0xcc   :  { %3053 = vmatpush3.msra.mxu0 %v265_v41 }
  0xcd   :  { %v2976_v43 = vpop.f32.mrf.mxu1  ;;  %3062 = vmatprep.subr.mxu0 %v3203_v0  ;;  %3055 = vmatmul.mubr.msk.f32.vlgmr.msra.gmra.mxu0 %vm49_vm0, %v1220_v40  ;;  %v3016_v47 = vpop.f32.mrf.mxu0 }
  0xce   :  { %3064 = vmatprep.mubr.msk.f32.mxu0 %vm3204_vm1, %v3203_v0 }
  0xcf   :  { %v338_v46 = vpop.f32.mrf.mxu1  ;;  %v995_v49 = vpop.f32.mrf.mxu0 }
  0xd0   :  { %3058 = vmatpush3.msra.mxu1 %v338_v46 }
  0xd1   :  { %v2981_v48 = vpop.f32.mrf.mxu1  ;;  %3067 = vmatprep.subr.mxu1 %v3203_v0  ;;  %3060 = vmatmul.mubr.msk.f32.vlgmr.msra.gmra.mxu1 %vm49_vm0, %v1221_v45  ;;  %v3026_v52 = vpop.f32.mrf.mxu0  ;;  %v3206_v45 = vmov 1934713408  }
  0xd2   :  { %3069 = vmatprep.mubr.msk.f32.mxu1 %vm3204_vm1, %v3203_v0  ;;  %v2469_v46 = vunpack.c.l.s4 %v3206_v45 }
  0xd3   :  { %v411_v51 = vpop.f32.mrf.mxu1  ;;  %v1141_v54 = vpop.f32.mrf.mxu0 }
  0xd4   :  { %3063 = vmatpush3.msra.mxu0 %v411_v51  ;;  %v2470_v51 = vunpack.c.0.s8 %v2469_v46 }
  0xd5   :  { %v2986_v53 = vpop.f32.mrf.mxu1  ;;  %3072 = vmatprep.subr.mxu0 %v3203_v0  ;;  %3065 = vmatmul.mubr.msk.f32.vlgmr.msra.gmra.mxu0 %vm49_vm0, %v1222_v50  ;;  %v3036_v57 = vpop.f32.mrf.mxu0 }
  0xd6   :  { %3074 = vmatprep.mubr.msk.f32.mxu0 %vm3204_vm1, %v3203_v0 }
  0xd7   :  { %v484_v56 = vpop.f32.mrf.mxu1 }
  0xd8   :  { %3068 = vmatpush3.msra.mxu1 %v484_v56 }
  0xd9   :  { %v2991_v58 = vpop.f32.mrf.mxu1  ;;  %3070 = vmatmul.mubr.msk.f32.vlgmr.msra.gmra.mxu1 %vm49_vm0, %v1223_v55  ;;  %3077 = vmatprep.subr.mxu1 %v3203_v0 }
  0xda   :  { %3079 = vmatprep.mubr.msk.f32.mxu1 %vm3204_vm1, %v3203_v0 }
  0xdb   :  { %v557_v60 = vpop.f32.mrf.mxu1 }
  0xdc   :  { %3073 = vmatpush3.msra.mxu0 %v557_v60 }
  0xdd   :  { %v2996_v61 = vpop.f32.mrf.mxu1  ;;  %3075 = vmatmul.mubr.msk.f32.vlgmr.msra.gmra.mxu0 %vm49_vm0, %v1224_v59  ;;  %3082 = vmatprep.subr.mxu0 %v3203_v0 }
  0xde   :  { %3083 = vmatpush3.msra.mxu0 %v703_v39  ;;  %3084 = vmatprep.mubr.msk.f32.mxu0 %vm3204_vm1, %v3203_v0  ;;  %v2408_v39 = vshrl.u32 %v2407_v35, 7  ;;  %v2758_v35 = vld [vmem:[%s3658_s3 + $0x38] sm:$0xff] }
  0xdf   :  { %v630_v63 = vpop.f32.mrf.mxu1  ;;  %3092 = vmatprep.subr.mxu0 %v3203_v0 }
  0xe0   :  { %3078 = vmatpush3.msra.mxu1 %v630_v63  ;;  %v3539_v43 = vsub.s32 %v2406_v38, %v2408_v39  ;;  %v3551_v58 = vsub.s32 %v2470_v51, %v2408_v39 }
  0xe1   :  { %v3001_v2 = vpop.f32.mrf.mxu1  ;;  %3080 = vmatmul.mubr.msk.f32.vlgmr.msra.gmra.mxu1 %vm49_vm0, %v1225_v62  ;;  %3087 = vmatprep.subr.mxu1 %v3203_v0 }
  0xe2   :  { %3085 = vmatmul.mubr.msk.f32.vlgmr.msra.gmra.mxu0 %vm49_vm0, %v1226_v1  ;;  %3089 = vmatprep.mubr.msk.f32.mxu1 %vm3204_vm1, %v3203_v0 }
  0xe3   :  { %v776_v4 = vpop.f32.mrf.mxu1  ;;  %3093 = vmatpush3.msra.mxu0 %v849_v44  ;;  %3094 = vmatprep.mubr.msk.f32.mxu0 %vm3204_vm1, %v3203_v0 }
  0xe4   :  { %3088 = vmatpush3.msra.mxu1 %v776_v4  ;;  %3102 = vmatprep.subr.mxu0 %v3203_v0 }
  0xe5   :  { %v3011_v6 = vpop.f32.mrf.mxu1  ;;  %3090 = vmatmul.mubr.msk.f32.vlgmr.msra.gmra.mxu1 %vm49_vm0, %v1227_v3  ;;  %3097 = vmatprep.subr.mxu1 %v3203_v0 }
  0xe6   :  { %3095 = vmatmul.mubr.msk.f32.vlgmr.msra.gmra.mxu0 %vm49_vm0, %v1228_v5  ;;  %3099 = vmatprep.mubr.msk.f32.mxu1 %vm3204_vm1, %v3203_v0 }
  0xe7   :  { %v922_v8 = vpop.f32.mrf.mxu1  ;;  %3103 = vmatpush3.msra.mxu0 %v995_v49  ;;  %3104 = vmatprep.mubr.msk.f32.mxu0 %vm3204_vm1, %v3203_v0 }
  0xe8   :  { %3098 = vmatpush3.msra.mxu1 %v922_v8  ;;  %3112 = vmatprep.subr.mxu0 %v3203_v0 }
  0xe9   :  { %v3021_v10 = vpop.f32.mrf.mxu1  ;;  %3100 = vmatmul.mubr.msk.f32.vlgmr.msra.gmra.mxu1 %vm49_vm0, %v1229_v7  ;;  %3107 = vmatprep.subr.mxu1 %v3203_v0 }
  0xea   :  { %3105 = vmatmul.mubr.msk.f32.vlgmr.msra.gmra.mxu0 %vm49_vm0, %v1230_v9  ;;  %3109 = vmatprep.mubr.msk.f32.mxu1 %vm3204_vm1, %v3203_v0 }
  0xeb   :  { %v1068_v12 = vpop.f32.mrf.mxu1  ;;  %3113 = vmatpush3.msra.mxu0 %v1141_v54  ;;  %3114 = vmatprep.mubr.msk.f32.mxu0 %vm3204_vm1, %v3203_v0 }
  0xec   :  { %3108 = vmatpush3.msra.mxu1 %v1068_v12  ;;  %3122 = vmatprep.subr.mxu0 %v2766_v18 }
  0xed   :  { %v3031_v14 = vpop.f32.mrf.mxu1  ;;  %3110 = vmatmul.mubr.msk.f32.vlgmr.msra.gmra.mxu1 %vm49_vm0, %v1231_v11  ;;  %3117 = vmatprep.subr.mxu1 %v3203_v0 }
  0xee   :  { %3115 = vmatmul.mubr.msk.f32.vlgmr.msra.gmra.mxu0 %vm49_vm0, %v1232_v13  ;;  %3119 = vmatprep.mubr.msk.f32.mxu1 %vm3204_vm1, %v3203_v0  ;;  %v2764_v0 = vld [vmem:[%s3658_s3 + $0x68] sm:$0xff] }
  0xef   :  { %v1214_v16 = vpop.f32.mrf.mxu1  ;;  %3123 = vmatpush3.msra.mxu0 %v2766_v18 }
  0xf0   :  { %3118 = vmatpush3.msra.mxu1 %v1214_v16  ;;  %3124 = vmatprep.subr.mxu0 %v2765_v19 }
  0xf1   :  { %v3041_v17 = vpop.f32.mrf.mxu1  ;;  %3120 = vmatmul.mubr.msk.f32.vlgmr.msra.gmra.mxu1 %vm49_vm0, %v1233_v15  ;;  %3125 = vmatpush3.msra.mxu0 %v2765_v19 }
  0xf2   :  { %3126 = vmatprep.subr.mxu0 %v2764_v0 }
  0xf3   :  { %3127 = vmatpush3.msra.mxu0 %v2764_v0 }
  0xf4   :  { %3128 = vmatprep.subr.mxu0 %v2763_v20 }
  0xf5   :  { %3129 = vmatpush3.msra.mxu0 %v2763_v20 }
  0xf6   :  { %3130 = vmatprep.subr.mxu0 %v2762_v21 }
  0xf7   :  { %3131 = vmatpush3.msra.mxu0 %v2762_v21 }
  0xf8   :  { %3132 = vmatprep.subr.mxu0 %v2761_v22 }
  0xf9   :  { %3133 = vmatpush3.msra.mxu0 %v2761_v22 }
  0xfa   :  { %3134 = vmatprep.subr.mxu0 %v2760_v23 }
  0xfb   :  { %3135 = vmatpush3.msra.mxu0 %v2760_v23 }
  0xfc   :  { %3136 = vmatprep.subr.mxu0 %v2759_v24 }
  0xfd   :  { %3137 = vmatpush3.msra.mxu0 %v2759_v24 }
  0xfe   :  { %3138 = vmatprep.subr.mxu0 %v2758_v35 }
  0xff   :  { %3139 = vmatpush3.msra.mxu0 %v2758_v35 }
 0x185   :  { %v1303_v25 = vpop.f32.mrf.mxu0 }
 0x187   :  { %v3046_v26 = vpop.f32.mrf.mxu0 }
 0x189   :  { %v3535_v27 = vpop.f32.mrf.mxu1 }
 0x18b   :  { %v3051_v28 = vpop.f32.mrf.mxu1 }
 0x18d   :  { %v1449_v29 = vpop.f32.mrf.mxu0 }
 0x18e   :  { %v2402_v42 = vcombine.low %v1303_v25, %v1449_v29  ;;  %v2403_v11 = vcombine.high %v1303_v25, %v1449_v29 }
 0x18f   :  { %v3056_v30 = vpop.f32.mrf.mxu0 }
 0x190   :  { %v3543_v49 = vrot.slane %v2402_v42, %v3539_v43  ;;  %v3567_v22 = vrot.slane %v2403_v11, %v3539_v43 }
 0x191   :  { %v1522_v31 = vpop.f32.mrf.mxu1 }
 0x192   :  { %v2418_v44 = vcombine.low %v3535_v27, %v1522_v31  ;;  %v2419_v13 = vcombine.high %v3535_v27, %v1522_v31 }
 0x193   :  { %v3061_v32 = vpop.f32.mrf.mxu1 }
 0x194   :  { %v3546_v50 = vrot.slane %v2418_v44, %v3539_v43  ;;  %v3570_v26 = vrot.slane %v2419_v13, %v3539_v43 }
 0x195   :  { %v3537_v36 = vpop.f32.mrf.mxu0 }
 0x196   :  { %v2466_v57 = vcombine.low %v3543_v49, %v3546_v50  ;;  %v2467_v31 = vcombine.high %v3543_v49, %v3546_v50  ;;  %v2483_v13 = vcombine.high %v3567_v22, %v3570_v26 }
 0x197   :  { %v3066_v37 = vpop.f32.mrf.mxu0 }
 0x198   :  { %v3556_v4 = vrot.slane %v2466_v57, %v3551_v58 }
 0x199   :  { %v1668_v40 = vpop.f32.mrf.mxu1 }
 0x19b   :  { %v3071_v41 = vpop.f32.mrf.mxu1 }
 0x19c   :  { %v2757_v41 = vld [vmem:[%s3658_s3 + $0x30] sm:$0xff] }
 0x19d   :  { %v1741_v47 = vpop.f32.mrf.mxu0  ;;  %3140 = vmatprep.subr.mxu0 %v2757_v41 }
 0x19e   :  { %v2434_v52 = vcombine.low %v3537_v36, %v1741_v47  ;;  %v2435_v19 = vcombine.high %v3537_v36, %v1741_v47  ;;  %v2482_v47 = vcombine.low %v3567_v22, %v3570_v26  ;;  %3141 = vmatpush3.msra.mxu0 %v2757_v41 }
 0x19f   :  { %v3076_v48 = vpop.f32.mrf.mxu0 }
 0x1a0   :  { %v2442_v59 = vrot.slane %v2434_v52, %v3539_v43  ;;  %v2449_v36 = vrot.slane %v2435_v19, %v3539_v43 }
 0x1a1   :  { %v1814_v53 = vpop.f32.mrf.mxu1 }
 0x1a2   :  { %v2450_v54 = vcombine.low %v1668_v40, %v1814_v53  ;;  %v1887_v55 = vpop.f32.mrf.mxu0  ;;  %v2451_v14 = vcombine.high %v1668_v40, %v1814_v53 }
 0x1a3   :  { %v3081_v56 = vpop.f32.mrf.mxu1 }
 0x1a4   :  { %v2458_v60 = vrot.slane %v2450_v54, %v3539_v43  ;;  %v3086_v61 = vpop.f32.mrf.mxu0  ;;  %v3573_v27 = vrot.slane %v2451_v14, %v3539_v43  ;;  %v2756_v54 = vld [vmem:[%s3658_s3 + $0x28] sm:$0xff]  ;;  %v2481_v56 = vrot.slane %v2467_v31, %v3551_v58  ;;  %v2490_v14 = vrot.slane %v2482_v47, %v3551_v58 }
 0x1a5   :  { %v1960_v62 = vpop.f32.mrf.mxu1  ;;  %3142 = vmatprep.subr.mxu0 %v2756_v54 }
 0x1a6   :  { %v2498_v63 = vcombine.low %v2442_v59, %v2458_v60  ;;  %v2033_v1 = vpop.f32.mrf.mxu0  ;;  %v2499_v28 = vcombine.high %v2442_v59, %v2458_v60  ;;  %v2514_v48 = vcombine.low %v2449_v36, %v3573_v27  ;;  %3143 = vmatpush3.msra.mxu0 %v2756_v54 }
 0x1a7   :  { %v3091_v2 = vpop.f32.mrf.mxu1  ;;  %v2538_v15 = vcombine.low %v1887_v55, %v2033_v1  ;;  %v2539_v0 = vcombine.high %v1887_v55, %v2033_v1 }
 0x1a8   :  { %v3096_v3 = vpop.f32.mrf.mxu0  ;;  %v3559_v5 = vrot.slane %v2498_v63, %v3551_v58  ;;  %v2513_v49 = vrot.slane %v2499_v28, %v3551_v58  ;;  %v2755_v63 = vld [vmem:[%s3658_s3 + $0x20] sm:$0xff]  ;;  %v2522_v1 = vrot.slane %v2514_v48, %v3551_v58 }
 0x1a9   :  { %v2106_v6 = vpop.f32.mrf.mxu1  ;;  %v2546_v29 = vrot.slane %v2538_v15, %v3539_v43  ;;  %v2553_v37 = vrot.slane %v2539_v0, %v3539_v43  ;;  %3144 = vmatprep.subr.mxu0 %v2755_v63 }
 0x1aa   :  { %v2179_v7 = vpop.f32.mrf.mxu0  ;;  %v2530_v8 = vcombine.low %v3556_v4, %v3559_v5  ;;  %v2554_v9 = vcombine.low %v1960_v62, %v2106_v6  ;;  %v2555_v17 = vcombine.high %v1960_v62, %v2106_v6  ;;  %v2533_v3 = vcombine.high %v2481_v56, %v2513_v49  ;;  %3145 = vmatpush3.msra.mxu0 %v2755_v63 }
 0x1ab   :  { %v3101_v10 = vpop.f32.mrf.mxu1  ;;  %v2531_v6 = vcombine.high %v3556_v4, %v3559_v5 }
 0x1ac   :  { %v3106_v12 = vpop.f32.mrf.mxu0  ;;  %v2562_v20 = vrot.slane %v2554_v9, %v3539_v43  ;;  %v2569_v32 = vrot.slane %v2555_v17, %v3539_v43 }
 0x1ad   :  { %v2252_v16 = vpop.f32.mrf.mxu1  ;;  %v2754_v12 = vld [vmem:[%s3658_s3 + $0x18] sm:$0xff] }
 0x1ae   :  { %v2325_v18 = vpop.f32.mrf.mxu0  ;;  %v2602_v38 = vcombine.low %v2546_v29, %v2562_v20  ;;  %v2603_v39 = vcombine.high %v2546_v29, %v2562_v20  ;;  %v2618_v50 = vcombine.low %v2553_v37, %v2569_v32  ;;  %v2619_v2 = vcombine.high %v2553_v37, %v2569_v32  ;;  %3146 = vmatprep.subr.mxu0 %v2754_v12 }
 0x1af   :  { %v3111_v21 = vpop.f32.mrf.mxu1  ;;  %v2570_v23 = vcombine.low %v2179_v7, %v2325_v18  ;;  %v2571_v24 = vcombine.high %v2179_v7, %v2325_v18  ;;  %3147 = vmatpush3.msra.mxu0 %v2754_v12  ;;  %v2535_v32 = vcombine.high %v2490_v14, %v2522_v1 }
 0x1b0   :  { %v3116_v25 = vpop.f32.mrf.mxu0  ;;  %v2617_v57 = vrot.slane %v2603_v39, %v3551_v58  ;;  %v3604_v61 = vrot.slane %v2602_v38, %v3551_v58  ;;  %v2626_v7 = vrot.slane %v2618_v50, %v3551_v58  ;;  %v2752_v21 = vld [vmem:[%s3658_s3 + $0x8] sm:$0xff]  ;;  %v2633_v22 = vrot.slane %v2619_v2, %v3551_v58 }
 0x1b1   :  { %v2398_v30 = vpop.f32.mrf.mxu1  ;;  %v2578_v42 = vrot.slane %v2570_v23, %v3539_v43  ;;  %v2585_v44 = vrot.slane %v2571_v24, %v3539_v43  ;;  %v2534_v23 = vcombine.low %v2490_v14, %v2522_v1  ;;  %v2532_v24 = vcombine.low %v2481_v56, %v2513_v49 }
 0x1b2   :  { %v2586_v33 = vcombine.low %v2252_v16, %v2398_v30  ;;  %v2587_v34 = vcombine.high %v2252_v16, %v2398_v30  ;;  %v2753_v16 = vld [vmem:[%s3658_s3 + $0x10] sm:$0xff]  ;;  %v2497_v25 = vrot.slane %v2483_v13, %v3551_v58  ;;  %v2751_v30 = vld [vmem:[%s3658_s3] sm:$0xff] }
 0x1b3   :  { %v3121_v40 = vpop.f32.mrf.mxu1  ;;  %3148 = vmatprep.subr.mxu0 %v2753_v16 }
 0x1b4   :  { %v2594_v45 = vrot.slane %v2586_v33, %v3539_v43  ;;  %v2601_v46 = vrot.slane %v2587_v34, %v3539_v43  ;;  %v2515_v43 = vcombine.high %v2449_v36, %v3573_v27  ;;  %3149 = vmatpush3.msra.mxu0 %v2753_v16 }
 0x1b5   :  { %3150 = vmatprep.subr.mxu0 %v2752_v21 }
 0x1b6   :  { %v2634_v51 = vcombine.low %v2578_v42, %v2594_v45  ;;  %v2635_v52 = vcombine.high %v2578_v42, %v2594_v45  ;;  %v2650_v53 = vcombine.low %v2585_v44, %v2601_v46  ;;  %v2651_v55 = vcombine.high %v2585_v44, %v2601_v46  ;;  %3151 = vmatpush3.msra.mxu0 %v2752_v21 }
 0x1b7   :  { %v2529_v20 = vrot.slane %v2515_v43, %v3551_v58  ;;  %3152 = vmatprep.subr.mxu0 %v2751_v30 }
 0x1b8   :  { %v2658_v59 = vrot.slane %v2650_v53, %v3551_v58  ;;  %v2649_v60 = vrot.slane %v2635_v52, %v3551_v58  ;;  %v3607_v62 = vrot.slane %v2634_v51, %v3551_v58  ;;  %v2665_v15 = vrot.slane %v2651_v55, %v3551_v58  ;;  %3153 = vmatpush3.msra.mxu0 %v2751_v30 }
 0x1b9   :  { %v2536_v31 = vcombine.low %v2497_v25, %v2529_v20  ;;  %v2537_v35 = vcombine.high %v2497_v25, %v2529_v20 }
 0x1ba   :  { %v2669_v9 = vcombine.high %v2617_v57, %v2649_v60  ;;  %v2667_v10 = vcombine.high %v3604_v61, %v3607_v62  ;;  %v2666_v11 = vcombine.low %v3604_v61, %v3607_v62  ;;  %v2670_v19 = vcombine.low %v2626_v7, %v2658_v59 }
 0x1bb   :  { %v2668_v0 = vcombine.low %v2617_v57, %v2649_v60  ;;  %v2672_v28 = vcombine.low %v2633_v22, %v2665_v15  ;;  %v2671_v29 = vcombine.high %v2626_v7, %v2658_v59  ;;  %v2673_v34 = vcombine.high %v2633_v22, %v2665_v15 }
 0x1bc   :  { %v3178_v17 = vpack.i.bf16 %v2669_v9, %v2533_v3  ;;  %v3168_v18 = vpack.i.bf16 %v2667_v10, %v2531_v6  ;;  %v3183_v26 = vpack.i.bf16 %v2670_v19, %v2534_v23 }
 0x1bd   :  { %v3173_v27 = vpack.i.bf16 %v2668_v0, %v2532_v24  ;;  %v3193_v33 = vpack.i.bf16 %v2672_v28, %v2536_v31  ;;  %v3188_v58 = vpack.i.bf16 %v2671_v29, %v2535_v32  ;;  %v3198_v36 = vpack.i.bf16 %v2673_v34, %v2537_v35 }
 0x1be   :  { %3179 = vrot.lane.b32.xlu1 %v3178_v17, %s3207_s30  ;;  %3169 = vrot.lane.b32.xlu0 %v3168_v18, %s3208_s5 }
 0x1c2   :  { %3184 = vrot.lane.b32.xlu1 %v3183_v26, %s3209_s8  ;;  %3174 = vrot.lane.b32.xlu0 %v3173_v27, %s3210_s2 }
 0x1c6   :  { %3194 = vrot.lane.b32.xlu1 %v3193_v33, %s3211_s9  ;;  %3189 = vrot.lane.b32.xlu0 %v3188_v58, %s3212_s10 }
 0x1ca   :  { %3199 = vrot.lane.b32.xlu0 %v3198_v36, %s3213_s11 }
 0x230   :  { %v3180_v37 = vpop.permute.xlu1 %3179  ;;  %v3170_v38 = vpop.permute.xlu0 %3169 }
 0x231   :  { %v3172_v39 = vunpack.i.h.bf16 %v3170_v38  ;;  %v3171_v40 = vunpack.i.l.bf16 %v3170_v38  ;;  %v3182_v46 = vunpack.i.h.bf16 %v3180_v37  ;;  %v3181_v47 = vunpack.i.l.bf16 %v3180_v37 }
 0x233   :  { %v2731_v48 = vsel %vm2730_vm2, %v2530_v8, %v3171_v40  ;;  %v2732_v49 = vsel %vm2730_vm2, %v2666_v11, %v3172_v39 }
 0x234   :  { %v3185_v41 = vpop.permute.xlu1 %3184  ;;  %v3175_v42 = vpop.permute.xlu0 %3174 }
 0x235   :  { %v3177_v44 = vunpack.i.h.bf16 %v3175_v42  ;;  %v3176_v45 = vunpack.i.l.bf16 %v3175_v42  ;;  %v3187_v52 = vunpack.i.h.bf16 %v3185_v41  ;;  %v3186_v53 = vunpack.i.l.bf16 %v3185_v41 }
 0x237   :  { %v2734_v50 = vsel %vm2733_vm3, %v2731_v48, %v3176_v45  ;;  %v2735_v51 = vsel %vm2733_vm3, %v2732_v49, %v3177_v44 }
 0x238   :  { %v2737_v54 = vsel %vm2736_vm4, %v2734_v50, %v3181_v47  ;;  %v2738_v43 = vsel %vm2736_vm4, %v2735_v51, %v3182_v46  ;;  %v3195_v55 = vpop.permute.xlu1 %3194  ;;  %v3190_v56 = vpop.permute.xlu0 %3189 }
 0x239   :  { %v3192_v57 = vunpack.i.h.bf16 %v3190_v56  ;;  %v3191_v59 = vunpack.i.l.bf16 %v3190_v56  ;;  %v3197_v4 = vunpack.i.h.bf16 %v3195_v55  ;;  %v3196_v5 = vunpack.i.l.bf16 %v3195_v55 }
 0x23a   :  { %v2741_v8 = vsel %vm2739_vm5, %v2738_v43, %v3187_v52  ;;  %v2740_v60 = vsel %vm2739_vm5, %v2737_v54, %v3186_v53 }
 0x23b   :  { %v2744_v63 = vsel %vm2742_vm6, %v2741_v8, %v3192_v57  ;;  %v2743_v61 = vsel %vm2742_vm6, %v2740_v60, %v3191_v59 }
 0x23c   :  { %v3200_v62 = vpop.permute.xlu0 %3199  ;;  %v2746_v3 = vsel %vm2745_vm7, %v2743_v61, %v3196_v5  ;;  %v2747_v6 = vsel %vm2745_vm7, %v2744_v63, %v3197_v4 }
 0x23d   :  { %v3202_v1 = vunpack.i.h.bf16 %v3200_v62  ;;  %v3201_v2 = vunpack.i.l.bf16 %v3200_v62 }
 0x23f   :  { %v2749_v7 = vsel %vm2748_vm8, %v2746_v3, %v3201_v2  ;;  %v2750_v9 = vsel %vm2748_vm8, %v2747_v6, %v3202_v1 }
 0x240   :  { %3154 = vmatprep.mubr.f32.mxu0 %v2749_v7 }
 0x241   :  { %3155 = vmatmul.mubr.f32.vlgmr.msra.gmra.mxu0 %v2750_v9 }
 0x301   :  { %v3156_v10 = vpop.f32.mrf.mxu0 }
 0x302   :  { %2843 = vst.msk [vmem:[%s3659_s4 + $0x8] sm:$0xff] %vm2730_vm2, %v3156_v10 }
 0x303   :  { %v2833_v11 = vpop.f32.mrf.mxu0 }
 0x304   :  { %2842 = vst.msk [vmem:[%s3659_s4] sm:$0xff] %vm2730_vm2, %v2833_v11 }

// kernel: triplet_interaction.3
= control target key start
LH: loop header
LB: loop body
LE: loop exit
PB: predicated region body
PF: predicated region fallthrough
CT: control target
= control target key end

     0   :  { %vm26_vm0 = vcmask 261120   ;;  %vm128_vm1 = vcmask 130048   ;;  %s476_s2 = inlined_call_operand.vmem [shape: f32[32,32], index: 2, kind: input, shape index: {}]   ;;  %s477_s0 = inlined_call_operand.vmem [shape: f32[16,32], index: 0, kind: input, shape index: {}]   ;;  %s478_s3 = inlined_call_operand.vmem [shape: f32[16,32], index: 3, kind: input, shape index: {}]   ;;  %s479_s1 = inlined_call_operand.vmem [shape: f32[16,16], index: 1, kind: input, shape index: {}]   ;;  %s480_s4 = inlined_call_operand.vmem [shape: f32[32,16], index: 4, kind: input, shape index: {}]   ;;  %s481_s5 = inlined_call_operand.vmem [shape: f32[16,16], index: 5, kind: output, shape index: {}]  }
   0x1   :  { %v25_v0 = vld [vmem:[%s476_s2 + $0x18] sm:$0xff]  ;;  %v24_v1 = vld [vmem:[%s476_s2 + $0x10] sm:$0xff]  ;;  %v20_v2 = vld [vmem:[%s477_s0] sm:$0xff] }
   0x2   :  { %345 = vmatprep.subr.mxu0 %v25_v0  ;;  %v23_v3 = vld [vmem:[%s476_s2 + $0x8] sm:$0xff]  ;;  %353 = vmatprep.mubr.msk.f32.mxu0 %vm26_vm0, %v20_v2  ;;  %v126_v5 = vld [vmem:[%s478_s3] sm:$0xff]  ;;  %v215_v10 = vld [vmem:[%s480_s4 + $0x18] sm:$0xff] }
   0x3   :  { %346 = vmatpush3.msra.mxu0 %v25_v0  ;;  %v127_v4 = vld [vmem:[%s478_s3 + $0x8] sm:$0xff]  ;;  %v22_v6 = vld [vmem:[%s476_s2] sm:$0xff]  ;;  %v214_v11 = vld [vmem:[%s480_s4 + $0x10] sm:$0xff] }
   0x4   :  { %347 = vmatprep.subr.mxu0 %v24_v1  ;;  %356 = vmatprep.subr.mxu1 %v127_v4  ;;  %v124_v7 = vld [vmem:[%s479_s1] sm:$0xff]  ;;  %v125_v8 = vld [vmem:[%s479_s1 + $0x8] sm:$0xff] }
   0x5   :  { %348 = vmatpush3.msra.mxu0 %v24_v1  ;;  %357 = vmatpush3.msra.mxu1 %v127_v4  ;;  %v21_v9 = vld [vmem:[%s477_s0 + $0x8] sm:$0xff]  ;;  %v212_v13 = vld [vmem:[%s480_s4] sm:$0xff] }
   0x6   :  { %349 = vmatprep.subr.mxu0 %v23_v3  ;;  %358 = vmatprep.subr.mxu1 %v126_v5  ;;  %v213_v12 = vld [vmem:[%s480_s4 + $0x8] sm:$0xff] }
   0x7   :  { %350 = vmatpush3.msra.mxu0 %v23_v3  ;;  %359 = vmatpush3.msra.mxu1 %v126_v5 }
   0x8   :  { %351 = vmatprep.subr.mxu0 %v22_v6  ;;  %360 = vmatprep.mubr.msk.f32.mxu1 %vm128_vm1, %v124_v7 }
   0x9   :  { %352 = vmatpush3.msra.mxu0 %v22_v6  ;;  %361 = vmatmul.mubr.msk.f32.vlgmr.msra.gmra.mxu1 %vm128_vm1, %v125_v8 }
   0xa   :  { %354 = vmatmul.mubr.msk.f32.vlgmr.msra.gmra.mxu0 %vm26_vm0, %v21_v9  ;;  %363 = vmatprep.subr.mxu1 %v215_v10 }
   0xb   :  { %364 = vmatpush3.msra.mxu1 %v215_v10 }
   0xc   :  { %365 = vmatprep.subr.mxu1 %v214_v11 }
   0xd   :  { %366 = vmatpush3.msra.mxu1 %v214_v11 }
   0xe   :  { %367 = vmatprep.subr.mxu1 %v213_v12 }
   0xf   :  { %368 = vmatpush3.msra.mxu1 %v213_v12 }
  0x10   :  { %369 = vmatprep.subr.mxu1 %v212_v13 }
  0x11   :  { %370 = vmatpush3.msra.mxu1 %v212_v13 }
  0xc9   :  { %v362_v25 = vpop.f32.mrf.mxu1 }
  0xca   :  { %v355_v14 = vpop.f32.mrf.mxu0 }
  0xcb   :  { %v322_v15 = vmul.f32 -1.442695, %v355_v14  ;;  %v201_v29 = vpop.f32.mrf.mxu1 }
  0xcc   :  { %v99_v16 = vpop.f32.mrf.mxu0 }
  0xcd   :  { %374 = vpow2.f32 %v322_v15  ;;  %v321_v17 = vmul.f32 -1.442695, %v99_v16 }
  0xcf   :  { %376 = vpow2.f32 %v321_v17 }
  0xda   :  { %v375_v18 = vpop.eup %374 }
  0xdb   :  { %v115_v19 = vadd.f32 1.0, %v375_v18 }
  0xdc   :  { %v377_v20 = vpop.eup %376 }
  0xdd   :  { %378 = vrcp.f32 %v115_v19  ;;  %v114_v21 = vadd.f32 1.0, %v377_v20 }
  0xdf   :  { %380 = vrcp.f32 %v114_v21 }
  0xea   :  { %v379_v22 = vpop.eup %378 }
  0xeb   :  { %v121_v23 = vmul.f32 %v379_v22, %v355_v14 }
  0xec   :  { %v381_v24 = vpop.eup %380 }
  0xed   :  { %v120_v26 = vmul.f32 %v381_v24, %v99_v16  ;;  %v123_v27 = vmul.f32 1.6666666, %v121_v23 }
  0xef   :  { %v122_v28 = vmul.f32 1.6666666, %v120_v26  ;;  %v211_v31 = vmul.f32 %v362_v25, %v123_v27 }
  0xf1   :  { %v210_v30 = vmul.f32 %v201_v29, %v122_v28 }
  0xf3   :  { %371 = vmatprep.mubr.msk.f32.mxu1 %vm26_vm0, %v210_v30 }
  0xf4   :  { %372 = vmatmul.mubr.msk.f32.vlgmr.msra.gmra.mxu1 %vm26_vm0, %v211_v31 }
 0x1b4   :  { %v373_v32 = vpop.f32.mrf.mxu1 }
 0x1b5   :  { %v328_v33 = vmul.f32 -1.442695, %v373_v32 }
 0x1b6   :  { %v288_v34 = vpop.f32.mrf.mxu1 }
 0x1b7   :  { %382 = vpow2.f32 %v328_v33  ;;  %v327_v35 = vmul.f32 -1.442695, %v288_v34 }
 0x1b9   :  { %384 = vpow2.f32 %v327_v35 }
 0x1c4   :  { %v383_v36 = vpop.eup %382 }
 0x1c5   :  { %v304_v37 = vadd.f32 1.0, %v383_v36 }
 0x1c6   :  { %v385_v38 = vpop.eup %384 }
 0x1c7   :  { %386 = vrcp.f32 %v304_v37  ;;  %v303_v39 = vadd.f32 1.0, %v385_v38 }
 0x1c9   :  { %388 = vrcp.f32 %v303_v39 }
 0x1d4   :  { %v387_v40 = vpop.eup %386 }
 0x1d5   :  { %v310_v41 = vmul.f32 %v387_v40, %v373_v32 }
 0x1d6   :  { %v389_v42 = vpop.eup %388 }
 0x1d7   :  { %v312_v43 = vmul.f32 1.6666666, %v310_v41  ;;  %v309_v44 = vmul.f32 %v389_v42, %v288_v34 }
 0x1d9   :  { %314 = vst.msk [vmem:[%s481_s5 + $0x8] sm:$0xff] %vm128_vm1, %v312_v43  ;;  %v311_v45 = vmul.f32 1.6666666, %v309_v44 }
 0x1db   :  { %313 = vst.msk [vmem:[%s481_s5] sm:$0xff] %vm128_vm1, %v311_v45 }

// kernel: triplet_interaction.5
= control target key start
LH: loop header
LB: loop body
LE: loop exit
PB: predicated region body
PF: predicated region fallthrough
CT: control target
= control target key end

     0   :  { %vm22_vm0 = vcmask 130048   ;;  %s370_s0 = inlined_call_operand.vmem [shape: f32[16,16], index: 0, kind: input, shape index: {}]   ;;  %s371_s1 = inlined_call_operand.vmem [shape: f32[16,16], index: 1, kind: input, shape index: {}]   ;;  %s372_s2 = inlined_call_operand.vmem [shape: f32[16,32], index: 2, kind: input, shape index: {}]   ;;  %s373_s3 = inlined_call_operand.vmem [shape: f32[16,32], index: 3, kind: input, shape index: {}]   ;;  %s374_s4 = inlined_call_operand.hbm [shape: f32[16,32], index: 4, kind: output, shape index: {}]  }
   0x1   :  { %v21_v0 = vld [vmem:[%s372_s2 + $0x8] sm:$0xff]  ;;  %v20_v2 = vld [vmem:[%s372_s2] sm:$0xff] }
   0x2   :  { %v123_v1 = vld [vmem:[%s373_s3 + $0x8] sm:$0xff]  ;;  %260 = vmatprep.subr.mxu0 %v21_v0  ;;  %v122_v3 = vld [vmem:[%s373_s3] sm:$0xff] }
   0x3   :  { %267 = vmatprep.subr.mxu1 %v123_v1  ;;  %v18_v4 = vld [vmem:[%s370_s0] sm:$0xff]  ;;  %261 = vmatpush3.msra.mxu0 %v21_v0 }
   0x4   :  { %268 = vmatpush3.msra.mxu1 %v123_v1  ;;  %v120_v5 = vld [vmem:[%s371_s1] sm:$0xff] }
   0x5   :  { %9 = vsyncpa [#allocation3], 0  ;;  %262 = vmatprep.subr.mxu0 %v20_v2  ;;  %269 = vmatprep.subr.mxu1 %v122_v3  ;;  %v19_v6 = vld [vmem:[%s370_s0 + $0x8] sm:$0xff]  ;;  %s315_s0 = smov [#allocation2]   ;;  %vm225_vm1 = vcmask 261120  }
   0x6   :  { %v121_v7 = vld [vmem:[%s371_s1 + $0x8] sm:$0xff]  ;;  %263 = vmatpush3.msra.mxu0 %v20_v2  ;;  %264 = vmatprep.mubr.msk.f32.mxu0 %vm22_vm0, %v18_v4  ;;  %s233_s1 = sshll.u32 %s315_s0, 4  ;;  %s234_s1 = int_to_ptr.vmem [resolvable:$true] %s233_s1 }
   0x7   :  { %270 = vmatpush3.msra.mxu1 %v122_v3  ;;  %271 = vmatprep.mubr.msk.f32.mxu1 %vm22_vm0, %v120_v5  ;;  %s293_s29 = scalar_lea.vmem %s234_s1, 256  ;;  %p298_p1 = scmp.lt.s32.totalorder %s234_s1, %s234_s1 }
   0x8   :  { %265 = vmatmul.mubr.msk.f32.vlgmr.msra.gmra.mxu0 %vm22_vm0, %v19_v6  ;;  %272 = vmatmul.mubr.msk.f32.vlgmr.msra.gmra.mxu1 %vm22_vm0, %v121_v7  ;;  %p294_p0 = scmp.ne.s32.totalorder %s234_s1, %s293_s29  ;;  %p299_p2 = scmp.lt.s32.totalorder %s293_s29, %s293_s29 }
   0xa   :  { %p300_p3 = por %p299_p2, %p298_p1 }
   0xc   :  { %p301_p4 = pnand %p300_p3, %p294_p0 }
  0xc8   :  { %v266_v8 = vpop.f32.mrf.mxu0  ;;  %v273_v9 = vpop.f32.mrf.mxu1 }
  0xc9   :  { %v247_v10 = vmul.f32 -1.442695, %v266_v8  ;;  %v251_v11 = vmul.f32 -1.442695, %v273_v9 }
  0xca   :  { %v95_v12 = vpop.f32.mrf.mxu0  ;;  %v196_v13 = vpop.f32.mrf.mxu1 }
  0xcb   :  { %277 = vpow2.f32 %v247_v10  ;;  %v246_v14 = vmul.f32 -1.442695, %v95_v12  ;;  %v250_v15 = vmul.f32 -1.442695, %v196_v13 }
  0xcc   :  { %279 = vpow2.f32 %v251_v11 }
  0xcd   :  { %281 = vpow2.f32 %v246_v14 }
  0xce   :  { %283 = vpow2.f32 %v250_v15 }
  0xd8   :  { %v278_v16 = vpop.eup %277 }
  0xd9   :  { %v280_v17 = vpop.eup %279  ;;  %v111_v18 = vadd.f32 1.0, %v278_v16 }
  0xda   :  { %v282_v19 = vpop.eup %281  ;;  %v212_v20 = vadd.f32 1.0, %v280_v17 }
  0xdb   :  { %v284_v21 = vpop.eup %283  ;;  %285 = vrcp.f32 %v111_v18  ;;  %v110_v22 = vadd.f32 1.0, %v282_v19 }
  0xdc   :  { %287 = vrcp.f32 %v212_v20  ;;  %v211_v23 = vadd.f32 1.0, %v284_v21 }
  0xdd   :  { %289 = vrcp.f32 %v110_v22 }
  0xde   :  { %291 = vrcp.f32 %v211_v23 }
  0xe8   :  { %v286_v24 = vpop.eup %285 }
  0xe9   :  { %v288_v25 = vpop.eup %287  ;;  %v117_v26 = vmul.f32 %v286_v24, %v266_v8 }
  0xea   :  { %v290_v27 = vpop.eup %289  ;;  %v218_v28 = vmul.f32 %v288_v25, %v273_v9 }
  0xeb   :  { %v292_v29 = vpop.eup %291  ;;  %v119_v30 = vmul.f32 1.6666666, %v117_v26  ;;  %v116_v31 = vmul.f32 %v290_v27, %v95_v12 }
  0xec   :  { %v220_v32 = vmul.f32 1.6666666, %v218_v28  ;;  %v217_v33 = vmul.f32 %v292_v29, %v196_v13 }
  0xed   :  { %v118_v34 = vmul.f32 1.6666666, %v116_v31 }
  0xee   :  { %v222_v35 = vadd.f32 %v220_v32, %v119_v30  ;;  %v219_v36 = vmul.f32 1.6666666, %v217_v33 }
  0xf0   :  { %v224_v37 = vmul.f32 0.70710677, %v222_v35  ;;  %v221_v38 = vadd.f32 %v219_v36, %v118_v34 }
  0xf2   :  { %v223_v39 = vmul.f32 0.70710677, %v221_v38  ;;  %227 = vst.msk [vmem:[#allocation2 + $0x8] sm:$0xff] %vm225_vm1, %v224_v37 }
  0xf4   :  { %226 = vst.msk [vmem:[#allocation2] sm:$0xff] %vm225_vm1, %v223_v39 }
  0xf5   :  { %304 = shalt.err (!%p301_p4)
}
  0xf6   :  { %s316_s30 = smov 128   ;;  %s317_s5 = smov 8  }
  0xf7   :  { %239 = dma.vmem_to_hbm [thread:$0]  %s234_s1, 256, %s374_s4, [#allocation3], %s316_s30, %s316_s30, %s317_s5  }
  0xf8   :  { %313 = dma.done.wait [#allocation3], 256  }
  0xf9   :  { %314 = vsyncadd [#allocation3], 4294967040 }
  0xfa   :  { %243 = vsyncpa [#allocation3], 1 }

// kernel: triplet_interaction.4
= control target key start
LH: loop header
LB: loop body
LE: loop exit
PB: predicated region body
PF: predicated region fallthrough
CT: control target
= control target key end

     0   :  { %v3699_v0 = vmov 0.0   ;;  %vm49_vm0 = vcmask 64512   ;;  %vm3700_vm1 = vmmov 0   ;;  %vm2424_vm2 = vcmask 1041409   ;;  %s4389_s1 = inlined_call_operand.vmem [shape: f32[16,8,16], index: 1, kind: input, shape index: {}]   ;;  %s4390_s0 = inlined_call_operand.vmem [shape: f32[16,8,8], index: 0, kind: input, shape index: {}]   ;;  %s4391_s2 = inlined_call_operand.vmem [shape: f32[16,8,8], index: 2, kind: input, shape index: {}]   ;;  %s4392_s3 = inlined_call_operand.vmem [shape: f32[8,16,16], index: 3, kind: input, shape index: {}]   ;;  %s4393_s4 = inlined_call_operand.vmem [shape: f32[16,16], index: 4, kind: output, shape index: {}]  }
   0x1   :  { %3481 = vmatprep.subr.mxu0 %v3699_v0  ;;  %3486 = vmatprep.subr.mxu1 %v3699_v0  ;;  %v33_v1 = vld [vmem:[%s4389_s1] sm:$0xff]  ;;  %v34_v2 = vld [vmem:[%s4389_s1 + $0x8] sm:$0xff]  ;;  %v35_v5 = vld [vmem:[%s4389_s1 + $0x10] sm:$0xff]  ;;  %vm2427_vm3 = vcmask 1042434   ;;  %vm2430_vm4 = vcmask 1043459   ;;  %vm2436_vm5 = vcmask 1045509  }
   0x2   :  { %v17_v3 = vld [vmem:[%s4390_s0] sm:$0xff]  ;;  %3482 = vmatpush3.msra.mxu0 %v33_v1  ;;  %3483 = vmatprep.mubr.msk.f32.mxu0 %vm3700_vm1, %v3699_v0  ;;  %v18_v4 = vld [vmem:[%s4390_s0 + $0x8] sm:$0xff]  ;;  %v36_v6 = vld [vmem:[%s4389_s1 + $0x18] sm:$0xff]  ;;  %vm2433_vm6 = vcmask 1044484   ;;  %vm2442_vm7 = vcmask 1047559   ;;  %vm2439_vm8 = vcmask 1046534  }
   0x3   :  { %3487 = vmatpush3.msra.mxu1 %v34_v2  ;;  %3488 = vmatprep.mubr.msk.f32.mxu1 %vm3700_vm1, %v3699_v0  ;;  %v19_v7 = vld [vmem:[%s4390_s0 + $0x10] sm:$0xff]  ;;  %v20_v8 = vld [vmem:[%s4390_s0 + $0x18] sm:$0xff]  ;;  %v37_v9 = vld [vmem:[%s4389_s1 + $0x20] sm:$0xff]  ;;  %vm2458_vm9 = vcmask 130048  }
   0x4   :  { %3484 = vmatmul.mubr.msk.f32.vlgmr.msra.gmra.mxu0 %vm49_vm0, %v17_v3  ;;  %3489 = vmatmul.mubr.msk.f32.vlgmr.msra.gmra.mxu1 %vm49_vm0, %v18_v4  ;;  %v38_v10 = vld [vmem:[%s4389_s1 + $0x28] sm:$0xff]  ;;  %v21_v11 = vld [vmem:[%s4390_s0 + $0x20] sm:$0xff]  ;;  %v39_v13 = vld [vmem:[%s4389_s1 + $0x30] sm:$0xff] }
   0x5   :  { %3491 = vmatprep.subr.mxu0 %v3699_v0  ;;  %3496 = vmatprep.subr.mxu1 %v3699_v0  ;;  %v22_v12 = vld [vmem:[%s4390_s0 + $0x28] sm:$0xff]  ;;  %v40_v14 = vld [vmem:[%s4389_s1 + $0x38] sm:$0xff]  ;;  %v23_v15 = vld [vmem:[%s4390_s0 + $0x30] sm:$0xff] }
   0x6   :  { %3492 = vmatpush3.msra.mxu0 %v35_v5  ;;  %3493 = vmatprep.mubr.msk.f32.mxu0 %vm3700_vm1, %v3699_v0  ;;  %v24_v16 = vld [vmem:[%s4390_s0 + $0x38] sm:$0xff]  ;;  %v41_v17 = vld [vmem:[%s4389_s1 + $0x40] sm:$0xff]  ;;  %v42_v18 = vld [vmem:[%s4389_s1 + $0x48] sm:$0xff] }
   0x7   :  { %3497 = vmatpush3.msra.mxu1 %v36_v6  ;;  %3498 = vmatprep.mubr.msk.f32.mxu1 %vm3700_vm1, %v3699_v0  ;;  %v25_v19 = vld [vmem:[%s4390_s0 + $0x40] sm:$0xff]  ;;  %v26_v20 = vld [vmem:[%s4390_s0 + $0x48] sm:$0xff]  ;;  %v43_v21 = vld [vmem:[%s4389_s1 + $0x50] sm:$0xff] }
   0x8   :  { %3494 = vmatmul.mubr.msk.f32.vlgmr.msra.gmra.mxu0 %vm49_vm0, %v19_v7  ;;  %3499 = vmatmul.mubr.msk.f32.vlgmr.msra.gmra.mxu1 %vm49_vm0, %v20_v8  ;;  %v44_v22 = vld [vmem:[%s4389_s1 + $0x58] sm:$0xff]  ;;  %v27_v23 = vld [vmem:[%s4390_s0 + $0x50] sm:$0xff]  ;;  %v45_v25 = vld [vmem:[%s4389_s1 + $0x60] sm:$0xff] }
   0x9   :  { %3501 = vmatprep.subr.mxu0 %v3699_v0  ;;  %3506 = vmatprep.subr.mxu1 %v3699_v0  ;;  %v28_v24 = vld [vmem:[%s4390_s0 + $0x58] sm:$0xff]  ;;  %v46_v26 = vld [vmem:[%s4389_s1 + $0x68] sm:$0xff]  ;;  %v29_v27 = vld [vmem:[%s4390_s0 + $0x60] sm:$0xff] }
   0xa   :  { %3502 = vmatpush3.msra.mxu0 %v37_v9  ;;  %3503 = vmatprep.mubr.msk.f32.mxu0 %vm3700_vm1, %v3699_v0  ;;  %v30_v28 = vld [vmem:[%s4390_s0 + $0x68] sm:$0xff]  ;;  %v47_v29 = vld [vmem:[%s4389_s1 + $0x70] sm:$0xff]  ;;  %v48_v30 = vld [vmem:[%s4389_s1 + $0x78] sm:$0xff] }
   0xb   :  { %3507 = vmatpush3.msra.mxu1 %v38_v10  ;;  %3508 = vmatprep.mubr.msk.f32.mxu1 %vm3700_vm1, %v3699_v0  ;;  %v31_v31 = vld [vmem:[%s4390_s0 + $0x70] sm:$0xff]  ;;  %v32_v32 = vld [vmem:[%s4390_s0 + $0x78] sm:$0xff]  ;;  %v1218_v33 = vld [vmem:[%s4391_s2] sm:$0xff] }
   0xc   :  { %3504 = vmatmul.mubr.msk.f32.vlgmr.msra.gmra.mxu0 %vm49_vm0, %v21_v11  ;;  %3509 = vmatmul.mubr.msk.f32.vlgmr.msra.gmra.mxu1 %vm49_vm0, %v22_v12  ;;  %v1219_v34 = vld [vmem:[%s4391_s2 + $0x8] sm:$0xff]  ;;  %v1220_v39 = vld [vmem:[%s4391_s2 + $0x10] sm:$0xff]  ;;  %v1221_v40 = vld [vmem:[%s4391_s2 + $0x18] sm:$0xff] }
   0xd   :  { %3511 = vmatprep.subr.mxu0 %v3699_v0  ;;  %3516 = vmatprep.subr.mxu1 %v3699_v0  ;;  %v1222_v45 = vld [vmem:[%s4391_s2 + $0x20] sm:$0xff]  ;;  %v1223_v46 = vld [vmem:[%s4391_s2 + $0x28] sm:$0xff]  ;;  %v1224_v51 = vld [vmem:[%s4391_s2 + $0x30] sm:$0xff] }
   0xe   :  { %3512 = vmatpush3.msra.mxu0 %v39_v13  ;;  %3513 = vmatprep.mubr.msk.f32.mxu0 %vm3700_vm1, %v3699_v0  ;;  %v1225_v52 = vld [vmem:[%s4391_s2 + $0x38] sm:$0xff]  ;;  %v1226_v57 = vld [vmem:[%s4391_s2 + $0x40] sm:$0xff]  ;;  %v1227_v58 = vld [vmem:[%s4391_s2 + $0x48] sm:$0xff] }
   0xf   :  { %3517 = vmatpush3.msra.mxu1 %v40_v14  ;;  %3518 = vmatprep.mubr.msk.f32.mxu1 %vm3700_vm1, %v3699_v0  ;;  %v1228_v63 = vld [vmem:[%s4391_s2 + $0x50] sm:$0xff]  ;;  %v1229_v1 = vld [vmem:[%s4391_s2 + $0x58] sm:$0xff]  ;;  %v1230_v6 = vld [vmem:[%s4391_s2 + $0x60] sm:$0xff] }
  0x10   :  { %3514 = vmatmul.mubr.msk.f32.vlgmr.msra.gmra.mxu0 %vm49_vm0, %v23_v15  ;;  %3519 = vmatmul.mubr.msk.f32.vlgmr.msra.gmra.mxu1 %vm49_vm0, %v24_v16  ;;  %v1231_v7 = vld [vmem:[%s4391_s2 + $0x68] sm:$0xff]  ;;  %v1232_v12 = vld [vmem:[%s4391_s2 + $0x70] sm:$0xff]  ;;  %v1233_v13 = vld [vmem:[%s4391_s2 + $0x78] sm:$0xff] }
  0x11   :  { %3521 = vmatprep.subr.mxu0 %v3699_v0  ;;  %3526 = vmatprep.subr.mxu1 %v3699_v0 }
  0x12   :  { %3522 = vmatpush3.msra.mxu0 %v41_v17  ;;  %3523 = vmatprep.mubr.msk.f32.mxu0 %vm3700_vm1, %v3699_v0 }
  0x13   :  { %3527 = vmatpush3.msra.mxu1 %v42_v18  ;;  %3528 = vmatprep.mubr.msk.f32.mxu1 %vm3700_vm1, %v3699_v0  ;;  %v3356_v18 = vld [vmem:[%s4392_s3 + $0x18] sm:$0xff] }
  0x14   :  { %3524 = vmatmul.mubr.msk.f32.vlgmr.msra.gmra.mxu0 %vm49_vm0, %v25_v19  ;;  %3529 = vmatmul.mubr.msk.f32.vlgmr.msra.gmra.mxu1 %vm49_vm0, %v26_v20  ;;  %v2403_v19 = vld [vmem:[%s4392_s3 + $0x8] sm:$0xff]  ;;  %v2402_v20 = vld [vmem:[%s4392_s3] sm:$0xff] }
  0x15   :  { %3531 = vmatprep.subr.mxu0 %v3699_v0  ;;  %3536 = vmatprep.subr.mxu1 %v3699_v0 }
  0x16   :  { %3532 = vmatpush3.msra.mxu0 %v43_v21  ;;  %3533 = vmatprep.mubr.msk.f32.mxu0 %vm3700_vm1, %v3699_v0  ;;  %v4013_v21 = vld [vmem:[%s4392_s3 + $0x28] sm:$0xff] }
  0x17   :  { %3537 = vmatpush3.msra.mxu1 %v44_v22  ;;  %3538 = vmatprep.mubr.msk.f32.mxu1 %vm3700_vm1, %v3699_v0  ;;  %v4018_v22 = vld [vmem:[%s4392_s3 + $0x38] sm:$0xff] }
  0x18   :  { %3534 = vmatmul.mubr.msk.f32.vlgmr.msra.gmra.mxu0 %vm49_vm0, %v27_v23  ;;  %3539 = vmatmul.mubr.msk.f32.vlgmr.msra.gmra.mxu1 %vm49_vm0, %v28_v24 }
  0x19   :  { %3541 = vmatprep.subr.mxu0 %v3699_v0  ;;  %3546 = vmatprep.subr.mxu1 %v3699_v0 }
  0x1a   :  { %3542 = vmatpush3.msra.mxu0 %v45_v25  ;;  %3543 = vmatprep.mubr.msk.f32.mxu0 %vm3700_vm1, %v3699_v0 }
  0x1b   :  { %3547 = vmatpush3.msra.mxu1 %v46_v26  ;;  %3548 = vmatprep.mubr.msk.f32.mxu1 %vm3700_vm1, %v3699_v0 }
  0x1c   :  { %3544 = vmatmul.mubr.msk.f32.vlgmr.msra.gmra.mxu0 %vm49_vm0, %v29_v27  ;;  %3549 = vmatmul.mubr.msk.f32.vlgmr.msra.gmra.mxu1 %vm49_vm0, %v30_v28 }
  0x1d   :  { %3551 = vmatprep.subr.mxu0 %v3699_v0  ;;  %3556 = vmatprep.subr.mxu1 %v3699_v0 }
  0x1e   :  { %3552 = vmatpush3.msra.mxu0 %v47_v29  ;;  %3553 = vmatprep.mubr.msk.f32.mxu0 %vm3700_vm1, %v3699_v0 }
  0x1f   :  { %3557 = vmatpush3.msra.mxu1 %v48_v30  ;;  %3558 = vmatprep.mubr.msk.f32.mxu1 %vm3700_vm1, %v3699_v0 }
  0x20   :  { %3554 = vmatmul.mubr.msk.f32.vlgmr.msra.gmra.mxu0 %vm49_vm0, %v31_v31  ;;  %3559 = vmatmul.mubr.msk.f32.vlgmr.msra.gmra.mxu1 %vm49_vm0, %v32_v32 }
  0x21   :  { %3561 = vmatprep.subr.mxu0 %v3699_v0  ;;  %3566 = vmatprep.subr.mxu1 %v3699_v0 }
  0x22   :  { %3563 = vmatprep.mubr.msk.f32.mxu0 %vm3700_vm1, %v3699_v0  ;;  %3568 = vmatprep.mubr.msk.f32.mxu1 %vm3700_vm1, %v3699_v0 }
  0xc4   :  { %v119_v35 = vpop.f32.mrf.mxu0  ;;  %v192_v36 = vpop.f32.mrf.mxu1 }
  0xc5   :  { %3562 = vmatpush3.msra.mxu0 %v119_v35  ;;  %3567 = vmatpush3.msra.mxu1 %v192_v36 }
  0xc6   :  { %v3485_v37 = vpop.f32.mrf.mxu0  ;;  %v3490_v38 = vpop.f32.mrf.mxu1  ;;  %3564 = vmatmul.mubr.msk.f32.vlgmr.msra.gmra.mxu0 %vm49_vm0, %v1218_v33  ;;  %3569 = vmatmul.mubr.msk.f32.vlgmr.msra.gmra.mxu1 %vm49_vm0, %v1219_v34 }
  0xc7   :  { %3571 = vmatprep.subr.mxu0 %v3699_v0  ;;  %3576 = vmatprep.subr.mxu1 %v3699_v0 }
  0xc8   :  { %v265_v41 = vpop.f32.mrf.mxu0  ;;  %v338_v42 = vpop.f32.mrf.mxu1  ;;  %3573 = vmatprep.mubr.msk.f32.mxu0 %vm3700_vm1, %v3699_v0  ;;  %3578 = vmatprep.mubr.msk.f32.mxu1 %vm3700_vm1, %v3699_v0 }
  0xc9   :  { %3572 = vmatpush3.msra.mxu0 %v265_v41  ;;  %3577 = vmatpush3.msra.mxu1 %v338_v42 }
  0xca   :  { %v3495_v43 = vpop.f32.mrf.mxu0  ;;  %v3500_v44 = vpop.f32.mrf.mxu1  ;;  %3574 = vmatmul.mubr.msk.f32.vlgmr.msra.gmra.mxu0 %vm49_vm0, %v1220_v39  ;;  %3579 = vmatmul.mubr.msk.f32.vlgmr.msra.gmra.mxu1 %vm49_vm0, %v1221_v40 }
  0xcb   :  { %3581 = vmatprep.subr.mxu0 %v3699_v0  ;;  %3586 = vmatprep.subr.mxu1 %v3699_v0 }
  0xcc   :  { %v411_v47 = vpop.f32.mrf.mxu0  ;;  %v484_v48 = vpop.f32.mrf.mxu1  ;;  %3583 = vmatprep.mubr.msk.f32.mxu0 %vm3700_vm1, %v3699_v0  ;;  %3588 = vmatprep.mubr.msk.f32.mxu1 %vm3700_vm1, %v3699_v0 }
  0xcd   :  { %3582 = vmatpush3.msra.mxu0 %v411_v47  ;;  %3587 = vmatpush3.msra.mxu1 %v484_v48 }
  0xce   :  { %v3505_v49 = vpop.f32.mrf.mxu0  ;;  %v3510_v50 = vpop.f32.mrf.mxu1  ;;  %3584 = vmatmul.mubr.msk.f32.vlgmr.msra.gmra.mxu0 %vm49_vm0, %v1222_v45  ;;  %3589 = vmatmul.mubr.msk.f32.vlgmr.msra.gmra.mxu1 %vm49_vm0, %v1223_v46 }
  0xcf   :  { %3591 = vmatprep.subr.mxu0 %v3699_v0  ;;  %3596 = vmatprep.subr.mxu1 %v3699_v0 }
  0xd0   :  { %v557_v53 = vpop.f32.mrf.mxu0  ;;  %v630_v54 = vpop.f32.mrf.mxu1  ;;  %3593 = vmatprep.mubr.msk.f32.mxu0 %vm3700_vm1, %v3699_v0  ;;  %3598 = vmatprep.mubr.msk.f32.mxu1 %vm3700_vm1, %v3699_v0 }
  0xd1   :  { %3592 = vmatpush3.msra.mxu0 %v557_v53  ;;  %3597 = vmatpush3.msra.mxu1 %v630_v54 }
  0xd2   :  { %v3515_v55 = vpop.f32.mrf.mxu0  ;;  %v3520_v56 = vpop.f32.mrf.mxu1  ;;  %3594 = vmatmul.mubr.msk.f32.vlgmr.msra.gmra.mxu0 %vm49_vm0, %v1224_v51  ;;  %3599 = vmatmul.mubr.msk.f32.vlgmr.msra.gmra.mxu1 %vm49_vm0, %v1225_v52 }
  0xd3   :  { %3601 = vmatprep.subr.mxu0 %v3699_v0  ;;  %3606 = vmatprep.subr.mxu1 %v3699_v0 }
  0xd4   :  { %v703_v59 = vpop.f32.mrf.mxu0  ;;  %v776_v60 = vpop.f32.mrf.mxu1  ;;  %3603 = vmatprep.mubr.msk.f32.mxu0 %vm3700_vm1, %v3699_v0  ;;  %3608 = vmatprep.mubr.msk.f32.mxu1 %vm3700_vm1, %v3699_v0 }
  0xd5   :  { %3602 = vmatpush3.msra.mxu0 %v703_v59  ;;  %3607 = vmatpush3.msra.mxu1 %v776_v60 }
  0xd6   :  { %v3525_v61 = vpop.f32.mrf.mxu0  ;;  %v3530_v62 = vpop.f32.mrf.mxu1  ;;  %3604 = vmatmul.mubr.msk.f32.vlgmr.msra.gmra.mxu0 %vm49_vm0, %v1226_v57  ;;  %3609 = vmatmul.mubr.msk.f32.vlgmr.msra.gmra.mxu1 %vm49_vm0, %v1227_v58 }
  0xd7   :  { %3611 = vmatprep.subr.mxu0 %v3699_v0  ;;  %3616 = vmatprep.subr.mxu1 %v3699_v0 }
  0xd8   :  { %v849_v2 = vpop.f32.mrf.mxu0  ;;  %v922_v3 = vpop.f32.mrf.mxu1  ;;  %3613 = vmatprep.mubr.msk.f32.mxu0 %vm3700_vm1, %v3699_v0  ;;  %3618 = vmatprep.mubr.msk.f32.mxu1 %vm3700_vm1, %v3699_v0 }
  0xd9   :  { %3612 = vmatpush3.msra.mxu0 %v849_v2  ;;  %3617 = vmatpush3.msra.mxu1 %v922_v3 }
  0xda   :  { %v3535_v4 = vpop.f32.mrf.mxu0  ;;  %v3540_v5 = vpop.f32.mrf.mxu1  ;;  %3614 = vmatmul.mubr.msk.f32.vlgmr.msra.gmra.mxu0 %vm49_vm0, %v1228_v63  ;;  %3619 = vmatmul.mubr.msk.f32.vlgmr.msra.gmra.mxu1 %vm49_vm0, %v1229_v1 }
  0xdb   :  { %3621 = vmatprep.subr.mxu0 %v3699_v0  ;;  %3626 = vmatprep.subr.mxu1 %v3699_v0 }
  0xdc   :  { %v995_v8 = vpop.f32.mrf.mxu0  ;;  %v1068_v9 = vpop.f32.mrf.mxu1  ;;  %3623 = vmatprep.mubr.msk.f32.mxu0 %vm3700_vm1, %v3699_v0  ;;  %3628 = vmatprep.mubr.msk.f32.mxu1 %vm3700_vm1, %v3699_v0 }
  0xdd   :  { %3622 = vmatpush3.msra.mxu0 %v995_v8  ;;  %3627 = vmatpush3.msra.mxu1 %v1068_v9 }
  0xde   :  { %v3545_v10 = vpop.f32.mrf.mxu0  ;;  %v3550_v11 = vpop.f32.mrf.mxu1  ;;  %3624 = vmatmul.mubr.msk.f32.vlgmr.msra.gmra.mxu0 %vm49_vm0, %v1230_v6  ;;  %3629 = vmatmul.mubr.msk.f32.vlgmr.msra.gmra.mxu1 %vm49_vm0, %v1231_v7 }
  0xdf   :  { %3631 = vmatprep.subr.mxu0 %v3699_v0  ;;  %3636 = vmatprep.subr.mxu1 %v3699_v0 }
  0xe0   :  { %v1141_v14 = vpop.f32.mrf.mxu0  ;;  %v1214_v15 = vpop.f32.mrf.mxu1  ;;  %3633 = vmatprep.mubr.msk.f32.mxu0 %vm3700_vm1, %v3699_v0  ;;  %3638 = vmatprep.mubr.msk.f32.mxu1 %vm3700_vm1, %v3699_v0  ;;  %v3355_v0 = vld [vmem:[%s4392_s3 + $0x10] sm:$0xff] }
  0xe1   :  { %3632 = vmatpush3.msra.mxu0 %v1141_v14  ;;  %3637 = vmatpush3.msra.mxu1 %v1214_v15 }
  0xe2   :  { %v3555_v16 = vpop.f32.mrf.mxu0  ;;  %v3560_v17 = vpop.f32.mrf.mxu1  ;;  %3634 = vmatmul.mubr.msk.f32.vlgmr.msra.gmra.mxu0 %vm49_vm0, %v1232_v12  ;;  %3639 = vmatmul.mubr.msk.f32.vlgmr.msra.gmra.mxu1 %vm49_vm0, %v1233_v13 }
  0xe3   :  { %3641 = vmatprep.subr.mxu0 %v3356_v18  ;;  %3648 = vmatprep.subr.mxu1 %v2403_v19 }
  0xe4   :  { %3642 = vmatpush3.msra.mxu0 %v3356_v18  ;;  %3649 = vmatpush3.msra.mxu1 %v2403_v19 }
  0xe5   :  { %3643 = vmatprep.subr.mxu0 %v3355_v0  ;;  %3650 = vmatprep.subr.mxu1 %v2402_v20 }
  0xe6   :  { %3644 = vmatpush3.msra.mxu0 %v3355_v0  ;;  %3651 = vmatpush3.msra.mxu1 %v2402_v20 }
  0xe7   :  { %3655 = vmatprep.subr.mxu0 %v4013_v21  ;;  %3662 = vmatprep.subr.mxu1 %v4018_v22 }
 0x186   :  { %v4022_v23 = vpop.f32.mrf.mxu0  ;;  %v4024_v24 = vpop.f32.mrf.mxu1 }
 0x187   :  { %v2423_v25 = vrot.slane %v4022_v23, 1  ;;  %v2648_v26 = vrot.slane %v4022_v23, 2  ;;  %v2760_v27 = vrot.slane %v4022_v23, 3  ;;  %v2872_v28 = vrot.slane %v4022_v23, 4 }
 0x188   :  { %v2984_v29 = vrot.slane %v4022_v23, 5  ;;  %v3096_v30 = vrot.slane %v4022_v23, 6  ;;  %v3208_v31 = vrot.slane %v4022_v23, 7  ;;  %v2538_v32 = vrot.slane %v4024_v24, 7  ;;  %v3565_v33 = vpop.f32.mrf.mxu0  ;;  %v3570_v34 = vpop.f32.mrf.mxu1 }
 0x189   :  { %v2649_v35 = vrot.slane %v4024_v24, 1  ;;  %v2761_v36 = vrot.slane %v4024_v24, 2  ;;  %v2873_v37 = vrot.slane %v4024_v24, 3  ;;  %v2985_v38 = vrot.slane %v4024_v24, 4 }
 0x18a   :  { %v3097_v39 = vrot.slane %v4024_v24, 5  ;;  %v3209_v40 = vrot.slane %v4024_v24, 6  ;;  %v4040_v41 = vpop.f32.mrf.mxu0  ;;  %v4042_v42 = vpop.f32.mrf.mxu1  ;;  %v2425_v43 = vsel %vm2424_vm2, %v4024_v24, %v2423_v25  ;;  %v2539_v44 = vsel %vm2424_vm2, %v2538_v32, %v4022_v23  ;;  %v3381_v24 = vld [vmem:[%s4392_s3 + $0x70] sm:$0xff] }
 0x18b   :  { %v2426_v45 = vrot.slane %v4040_v41, 7  ;;  %v2429_v46 = vrot.slane %v4042_v42, 6  ;;  %v2540_v47 = vrot.slane %v4040_v41, 6  ;;  %v2542_v48 = vrot.slane %v4042_v42, 5 }
 0x18c   :  { %v3575_v49 = vpop.f32.mrf.mxu0  ;;  %v3580_v50 = vpop.f32.mrf.mxu1  ;;  %v2650_v51 = vsel %vm2424_vm2, %v2649_v35, %v2648_v26  ;;  %v2652_v52 = vrot.slane %v4042_v42, 7  ;;  %v2762_v53 = vsel %vm2424_vm2, %v2761_v36, %v2760_v27  ;;  %v2763_v54 = vrot.slane %v4040_v41, 1 }
 0x18d   :  { %v2428_v55 = vsel %vm2427_vm3, %v2426_v45, %v2425_v43  ;;  %v2541_v56 = vsel %vm2427_vm3, %v2540_v47, %v2539_v44  ;;  %v2651_v57 = vsel %vm2427_vm3, %v4040_v41, %v2650_v51  ;;  %v2874_v58 = vsel %vm2424_vm2, %v2873_v37, %v2872_v28 }
 0x18e   :  { %v4061_v59 = vpop.f32.mrf.mxu0  ;;  %v4063_v60 = vpop.f32.mrf.mxu1  ;;  %v2431_v61 = vsel %vm2430_vm4, %v2429_v46, %v2428_v55  ;;  %v2543_v62 = vsel %vm2430_vm4, %v2542_v48, %v2541_v56  ;;  %v2653_v63 = vsel %vm2430_vm4, %v2652_v52, %v2651_v57  ;;  %v2764_v1 = vsel %vm2427_vm3, %v2763_v54, %v2762_v53 }
 0x18f   :  { %v2432_v2 = vrot.slane %v4061_v59, 5  ;;  %v2435_v3 = vrot.slane %v4063_v60, 4  ;;  %v2544_v4 = vrot.slane %v4061_v59, 4  ;;  %v2546_v5 = vrot.slane %v4063_v60, 3 }
 0x190   :  { %v3585_v6 = vpop.f32.mrf.mxu0  ;;  %v3590_v7 = vpop.f32.mrf.mxu1  ;;  %v2654_v8 = vrot.slane %v4061_v59, 6  ;;  %v2656_v9 = vrot.slane %v4063_v60, 5  ;;  %v2765_v10 = vsel %vm2430_vm4, %v4042_v42, %v2764_v1  ;;  %v2766_v11 = vrot.slane %v4061_v59, 7 }
 0x191   :  { %v2434_v12 = vsel %vm2433_vm6, %v2432_v2, %v2431_v61  ;;  %v2545_v13 = vsel %vm2433_vm6, %v2544_v4, %v2543_v62  ;;  %v2768_v14 = vrot.slane %v4063_v60, 6  ;;  %v2875_v15 = vrot.slane %v4040_v41, 2 }
 0x192   :  { %v4082_v16 = vpop.f32.mrf.mxu0  ;;  %v4084_v17 = vpop.f32.mrf.mxu1  ;;  %v2437_v18 = vsel %vm2436_vm5, %v2435_v3, %v2434_v12  ;;  %v2547_v19 = vsel %vm2436_vm5, %v2546_v5, %v2545_v13  ;;  %v2655_v0 = vsel %vm2433_vm6, %v2654_v8, %v2653_v63  ;;  %v2767_v20 = vsel %vm2433_vm6, %v2766_v11, %v2765_v10 }
 0x193   :  { %v2438_v25 = vrot.slane %v4082_v16, 3  ;;  %v2441_v26 = vrot.slane %v4084_v17, 2  ;;  %v2548_v27 = vrot.slane %v4082_v16, 2  ;;  %v2550_v28 = vrot.slane %v4084_v17, 1 }
 0x194   :  { %v3595_v32 = vpop.f32.mrf.mxu0  ;;  %v3600_v33 = vpop.f32.mrf.mxu1  ;;  %v2657_v34 = vsel %vm2436_vm5, %v2656_v9, %v2655_v0  ;;  %v2658_v35 = vrot.slane %v4082_v16, 4  ;;  %v2660_v36 = vrot.slane %v4084_v17, 3  ;;  %v2769_v37 = vsel %vm2436_vm5, %v2768_v14, %v2767_v20 }
 0x195   :  { %v2440_v43 = vsel %vm2439_vm8, %v2438_v25, %v2437_v18  ;;  %v2549_v44 = vsel %vm2439_vm8, %v2548_v27, %v2547_v19  ;;  %v2770_v45 = vrot.slane %v4082_v16, 5  ;;  %v2772_v46 = vrot.slane %v4084_v17, 4 }
 0x196   :  { %v4102_v47 = vpop.f32.mrf.mxu0  ;;  %v4104_v48 = vpop.f32.mrf.mxu1  ;;  %v2443_v49 = vsel %vm2442_vm7, %v2441_v26, %v2440_v43  ;;  %v2551_v50 = vsel %vm2442_vm7, %v2550_v28, %v2549_v44  ;;  %v2659_v51 = vsel %vm2439_vm8, %v2658_v35, %v2657_v34  ;;  %v4110_v52 = vsel %vm2427_vm3, %v2875_v15, %v2874_v58 }
 0x197   :  { %v2444_v53 = vrot.slane %v4102_v47, 1  ;;  %v2662_v54 = vrot.slane %v4102_v47, 2  ;;  %v2774_v55 = vrot.slane %v4102_v47, 3  ;;  %v2886_v56 = vrot.slane %v4102_v47, 4  ;;  %3645 = vmatprep.mubr.msk.f32.mxu0 %vm2458_vm9, %v2443_v49  ;;  %3652 = vmatprep.mubr.msk.f32.mxu1 %vm2458_vm9, %v2551_v50 }
 0x198   :  { %v2998_v57 = vrot.slane %v4102_v47, 5  ;;  %v3110_v61 = vrot.slane %v4102_v47, 6  ;;  %v3222_v62 = vrot.slane %v4102_v47, 7  ;;  %v2552_v58 = vrot.slane %v4104_v48, 7  ;;  %v3605_v63 = vpop.f32.mrf.mxu0  ;;  %v3610_v1 = vpop.f32.mrf.mxu1 }
 0x199   :  { %v2663_v2 = vrot.slane %v4104_v48, 1  ;;  %v2775_v3 = vrot.slane %v4104_v48, 2  ;;  %v2887_v4 = vrot.slane %v4104_v48, 3  ;;  %v2999_v5 = vrot.slane %v4104_v48, 4 }
 0x19a   :  { %v3111_v6 = vrot.slane %v4104_v48, 5  ;;  %v3223_v7 = vrot.slane %v4104_v48, 6  ;;  %v4128_v8 = vpop.f32.mrf.mxu0  ;;  %v4130_v9 = vpop.f32.mrf.mxu1  ;;  %v2445_v10 = vsel %vm2424_vm2, %v4104_v48, %v2444_v53  ;;  %v2553_v11 = vsel %vm2424_vm2, %v2552_v58, %v4102_v47 }
 0x19b   :  { %v2446_v12 = vrot.slane %v4128_v8, 7  ;;  %v2554_v13 = vrot.slane %v4128_v8, 6  ;;  %v2777_v14 = vrot.slane %v4128_v8, 1  ;;  %v2889_v15 = vrot.slane %v4128_v8, 2 }
 0x19c   :  { %v3001_v18 = vrot.slane %v4128_v8, 3  ;;  %v3113_v19 = vrot.slane %v4128_v8, 4  ;;  %v3225_v0 = vrot.slane %v4128_v8, 5  ;;  %v3615_v20 = vpop.f32.mrf.mxu0  ;;  %v3620_v25 = vpop.f32.mrf.mxu1  ;;  %v2448_v26 = vrot.slane %v4130_v9, 6 }
 0x19d   :  { %v2447_v27 = vsel %vm2427_vm3, %v2446_v12, %v2445_v10  ;;  %v2555_v28 = vsel %vm2427_vm3, %v2554_v13, %v2553_v11  ;;  %v2556_v32 = vrot.slane %v4130_v9, 5  ;;  %v2661_v33 = vsel %vm2442_vm7, %v2660_v36, %v2659_v51 }
 0x19e   :  { %v4148_v34 = vpop.f32.mrf.mxu0  ;;  %v4150_v35 = vpop.f32.mrf.mxu1  ;;  %v2449_v43 = vsel %vm2430_vm4, %v2448_v26, %v2447_v27  ;;  %v2771_v44 = vsel %vm2439_vm8, %v2770_v45, %v2769_v37  ;;  %v2664_v49 = vsel %vm2424_vm2, %v2663_v2, %v2662_v54  ;;  %v2666_v50 = vrot.slane %v4130_v9, 7 }
 0x19f   :  { %v2450_v53 = vrot.slane %v4148_v34, 5  ;;  %v2452_v58 = vrot.slane %v4150_v35, 4  ;;  %v2557_v63 = vsel %vm2430_vm4, %v2556_v32, %v2555_v28  ;;  %v2558_v36 = vrot.slane %v4148_v34, 4 }
 0x1a0   :  { %v3625_v51 = vpop.f32.mrf.mxu0  ;;  %v3630_v1 = vpop.f32.mrf.mxu1  ;;  %v2560_v10 = vrot.slane %v4150_v35, 3  ;;  %v2773_v11 = vsel %vm2442_vm7, %v2772_v46, %v2771_v44  ;;  %v2665_v37 = vsel %vm2427_vm3, %v4128_v8, %v2664_v49  ;;  %v2668_v45 = vrot.slane %v4148_v34, 6 }
 0x1a1   :  { %v2451_v54 = vsel %vm2433_vm6, %v2450_v53, %v2449_v43  ;;  %v2559_v2 = vsel %vm2433_vm6, %v2558_v36, %v2557_v63  ;;  %v2667_v12 = vsel %vm2430_vm4, %v2666_v50, %v2665_v37  ;;  %v2670_v13 = vrot.slane %v4150_v35, 5 }
 0x1a2   :  { %v4169_v20 = vpop.f32.mrf.mxu0  ;;  %v4171_v25 = vpop.f32.mrf.mxu1  ;;  %v2453_v26 = vsel %vm2436_vm5, %v2452_v58, %v2451_v54  ;;  %v2561_v46 = vsel %vm2436_vm5, %v2560_v10, %v2559_v2  ;;  %v2669_v27 = vsel %vm2433_vm6, %v2668_v45, %v2667_v12  ;;  %v2776_v28 = vsel %vm2424_vm2, %v2775_v3, %v2774_v55  ;;  %v3365_v12 = vld [vmem:[%s4392_s3 + $0x30] sm:$0xff] }
 0x1a3   :  { %v2454_v32 = vrot.slane %v4169_v20, 3  ;;  %v2456_v43 = vrot.slane %v4171_v25, 2  ;;  %v2562_v44 = vrot.slane %v4169_v20, 2  ;;  %v2564_v49 = vrot.slane %v4171_v25, 1 }
 0x1a4   :  { %v3635_v50 = vpop.f32.mrf.mxu0  ;;  %v3640_v53 = vpop.f32.mrf.mxu1  ;;  %v2671_v63 = vsel %vm2436_vm5, %v2670_v13, %v2669_v27  ;;  %v2672_v58 = vrot.slane %v4169_v20, 4  ;;  %v2674_v36 = vrot.slane %v4171_v25, 3  ;;  %v2778_v51 = vsel %vm2427_vm3, %v2777_v14, %v2776_v28  ;;  %v3361_v14 = vld [vmem:[%s4392_s3 + $0x20] sm:$0xff] }
 0x1a5   :  { %v2455_v55 = vsel %vm2439_vm8, %v2454_v32, %v2453_v26  ;;  %v2563_v3 = vsel %vm2439_vm8, %v2562_v44, %v2561_v46  ;;  %v2779_v1 = vsel %vm2430_vm4, %v4130_v9, %v2778_v51  ;;  %v2780_v10 = vrot.slane %v4148_v34, 7 }
 0x1a6   :  { %v2457_v37 = vsel %vm2442_vm7, %v2456_v43, %v2455_v55  ;;  %v2565_v45 = vsel %vm2442_vm7, %v2564_v49, %v2563_v3  ;;  %v2673_v54 = vsel %vm2439_vm8, %v2672_v58, %v2671_v63  ;;  %v2782_v2 = vrot.slane %v4150_v35, 6 }
 0x1a7   :  { %3646 = vmatmul.mubr.msk.f32.vlgmr.msra.gmra.mxu0 %vm2458_vm9, %v2457_v37  ;;  %3653 = vmatmul.mubr.msk.f32.vlgmr.msra.gmra.mxu1 %vm2458_vm9, %v2565_v45  ;;  %v2675_v13 = vsel %vm2442_vm7, %v2674_v36, %v2673_v54  ;;  %v2781_v26 = vsel %vm2433_vm6, %v2780_v10, %v2779_v1  ;;  %v2784_v46 = vrot.slane %v4169_v20, 5  ;;  %v2786_v27 = vrot.slane %v4171_v25, 4  ;;  %v3369_v1 = vld [vmem:[%s4392_s3 + $0x40] sm:$0xff] }
 0x1a8   :  { %3656 = vmatpush3.msra.mxu0 %v4013_v21  ;;  %3659 = vmatprep.mubr.msk.f32.mxu0 %vm2458_vm9, %v2661_v33  ;;  %v2783_v28 = vsel %vm2436_vm5, %v2782_v2, %v2781_v26  ;;  %v2877_v32 = vrot.slane %v4042_v42, 1  ;;  %v2880_v43 = vrot.slane %v4063_v60, 7  ;;  %v2882_v44 = vrot.slane %v4082_v16, 6  ;;  %v3373_v2 = vld [vmem:[%s4392_s3 + $0x50] sm:$0xff] }
 0x1a9   :  { %3663 = vmatpush3.msra.mxu1 %v4018_v22  ;;  %3666 = vmatprep.mubr.msk.f32.mxu1 %vm2458_vm9, %v2773_v11  ;;  %v2785_v49 = vsel %vm2439_vm8, %v2784_v46, %v2783_v28  ;;  %v2884_v50 = vrot.slane %v4084_v17, 5  ;;  %v2986_v21 = vsel %vm2424_vm2, %v2985_v38, %v2984_v29  ;;  %v2987_v33 = vrot.slane %v4040_v41, 3  ;;  %v3370_v22 = vld [vmem:[%s4392_s3 + $0x48] sm:$0xff]  ;;  %v3374_v11 = vld [vmem:[%s4392_s3 + $0x58] sm:$0xff] }
 0x1aa   :  { %3657 = vmatprep.subr.mxu0 %v3361_v14  ;;  %3664 = vmatprep.subr.mxu1 %v3365_v12  ;;  %v2787_v53 = vsel %vm2442_vm7, %v2786_v27, %v2785_v49  ;;  %v2878_v63 = vsel %vm2430_vm4, %v2877_v32, %v4110_v52  ;;  %v2989_v58 = vrot.slane %v4042_v42, 2  ;;  %v2991_v29 = vrot.slane %v4061_v59, 1  ;;  %v3378_v32 = vld [vmem:[%s4392_s3 + $0x68] sm:$0xff] }
 0x1ab   :  { %3658 = vmatpush3.msra.mxu0 %v3361_v14  ;;  %3665 = vmatpush3.msra.mxu1 %v3365_v12  ;;  %v2879_v38 = vsel %vm2433_vm6, %v4061_v59, %v2878_v63  ;;  %v2988_v36 = vsel %vm2427_vm3, %v2987_v33, %v2986_v21  ;;  %v2994_v51 = vrot.slane %v4082_v16, 7  ;;  %v2996_v55 = vrot.slane %v4084_v17, 6 }
 0x1ac   :  { %3660 = vmatmul.mubr.msk.f32.vlgmr.msra.gmra.mxu0 %vm2458_vm9, %v2675_v13  ;;  %3667 = vmatmul.mubr.msk.f32.vlgmr.msra.gmra.mxu1 %vm2458_vm9, %v2787_v53  ;;  %v2881_v52 = vsel %vm2436_vm5, %v2880_v43, %v2879_v38  ;;  %v2990_v3 = vsel %vm2430_vm4, %v2989_v58, %v2988_v36  ;;  %v2888_v10 = vsel %vm2424_vm2, %v2887_v4, %v2886_v56  ;;  %v2891_v37 = vrot.slane %v4130_v9, 1  ;;  %v3382_v43 = vld [vmem:[%s4392_s3 + $0x78] sm:$0xff]  ;;  %v3377_v58 = vld [vmem:[%s4392_s3 + $0x60] sm:$0xff] }
 0x1ad   :  { %3669 = vmatprep.subr.mxu0 %v3370_v22  ;;  %3676 = vmatprep.subr.mxu1 %v3374_v11  ;;  %v2883_v45 = vsel %vm2439_vm8, %v2882_v44, %v2881_v52  ;;  %v2992_v54 = vsel %vm2433_vm6, %v2991_v29, %v2990_v3  ;;  %v2890_v14 = vsel %vm2427_vm3, %v2889_v15, %v2888_v10  ;;  %v2894_v12 = vrot.slane %v4150_v35, 7 }
 0x1ae   :  { %3670 = vmatpush3.msra.mxu0 %v3370_v22  ;;  %v2885_v56 = vsel %vm2442_vm7, %v2884_v50, %v2883_v45  ;;  %3677 = vmatpush3.msra.mxu1 %v3374_v11  ;;  %v2993_v4 = vsel %vm2436_vm5, %v4063_v60, %v2992_v54  ;;  %v2892_v13 = vsel %vm2430_vm4, %v2891_v37, %v2890_v14  ;;  %v2896_v26 = vrot.slane %v4169_v20, 6 }
 0x1af   :  { %3673 = vmatprep.mubr.msk.f32.mxu0 %vm2458_vm9, %v2885_v56  ;;  %v2995_v46 = vsel %vm2439_vm8, %v2994_v51, %v2993_v4  ;;  %3671 = vmatprep.subr.mxu0 %v3369_v1  ;;  %v2893_v15 = vsel %vm2433_vm6, %v4148_v34, %v2892_v13  ;;  %v2898_v27 = vrot.slane %v4171_v25, 5  ;;  %v3000_v28 = vsel %vm2424_vm2, %v2999_v5, %v2998_v57 }
 0x1b0   :  { %v2997_v44 = vsel %vm2442_vm7, %v2996_v55, %v2995_v46  ;;  %3678 = vmatprep.subr.mxu1 %v3373_v2  ;;  %3672 = vmatpush3.msra.mxu0 %v3369_v1  ;;  %v2895_v49 = vsel %vm2436_vm5, %v2894_v12, %v2893_v15  ;;  %v3002_v50 = vsel %vm2427_vm3, %v3001_v18, %v3000_v28  ;;  %v3003_v57 = vrot.slane %v4130_v9, 2 }
 0x1b1   :  { %3680 = vmatprep.mubr.msk.f32.mxu1 %vm2458_vm9, %v2997_v44  ;;  %3679 = vmatpush3.msra.mxu1 %v3373_v2  ;;  %v2897_v5 = vsel %vm2439_vm8, %v2896_v26, %v2895_v49  ;;  %v3005_v21 = vrot.slane %v4148_v34, 1  ;;  %v3008_v33 = vrot.slane %v4169_v20, 7  ;;  %v3010_v53 = vrot.slane %v4171_v25, 6 }
 0x1b2   :  { %v2899_v22 = vsel %vm2442_vm7, %v2898_v27, %v2897_v5  ;;  %v3004_v11 = vsel %vm2430_vm4, %v3003_v57, %v3002_v50  ;;  %3683 = vmatprep.subr.mxu0 %v3378_v32  ;;  %3690 = vmatprep.subr.mxu1 %v3382_v43  ;;  %v3098_v18 = vsel %vm2424_vm2, %v3097_v39, %v3096_v30  ;;  %v3099_v63 = vrot.slane %v4040_v41, 4 }
 0x1b3   :  { %3674 = vmatmul.mubr.msk.f32.vlgmr.msra.gmra.mxu0 %vm2458_vm9, %v2899_v22  ;;  %v3006_v29 = vsel %vm2433_vm6, %v3005_v21, %v3004_v11  ;;  %v3101_v38 = vrot.slane %v4042_v42, 3  ;;  %v3103_v36 = vrot.slane %v4061_v59, 2  ;;  %v3105_v51 = vrot.slane %v4063_v60, 1 }
 0x1b4   :  { %v3007_v55 = vsel %vm2436_vm5, %v4150_v35, %v3006_v29  ;;  %3684 = vmatpush3.msra.mxu0 %v3378_v32  ;;  %v3100_v30 = vsel %vm2427_vm3, %v3099_v63, %v3098_v18  ;;  %v3108_v39 = vrot.slane %v4084_v17, 7  ;;  %v3210_v52 = vsel %vm2424_vm2, %v3209_v40, %v3208_v31 }
 0x1b5   :  { %v3009_v3 = vsel %vm2439_vm8, %v3008_v33, %v3007_v55  ;;  %v3102_v1 = vsel %vm2430_vm4, %v3101_v38, %v3100_v30  ;;  %v3211_v10 = vrot.slane %v4040_v41, 5  ;;  %v3213_v37 = vrot.slane %v4042_v42, 4  ;;  %3685 = vmatprep.subr.mxu0 %v3377_v58 }
 0x1b6   :  { %v3011_v45 = vsel %vm2442_vm7, %v3010_v53, %v3009_v3  ;;  %v3104_v54 = vsel %vm2433_vm6, %v3103_v36, %v3102_v1  ;;  %v3215_v2 = vrot.slane %v4061_v59, 3  ;;  %v3217_v23 = vrot.slane %v4063_v60, 2  ;;  %3686 = vmatpush3.msra.mxu0 %v3377_v58 }
 0x1b7   :  { %3681 = vmatmul.mubr.msk.f32.vlgmr.msra.gmra.mxu1 %vm2458_vm9, %v3011_v45  ;;  %v3106_v31 = vsel %vm2436_vm5, %v3105_v51, %v3104_v54  ;;  %v3212_v40 = vsel %vm2427_vm3, %v3211_v10, %v3210_v52  ;;  %v3219_v41 = vrot.slane %v4082_v16, 1  ;;  %v3112_v42 = vsel %vm2424_vm2, %v3111_v6, %v3110_v61 }
 0x1b8   :  { %v3107_v59 = vsel %vm2439_vm8, %v4082_v16, %v3106_v31  ;;  %3691 = vmatpush3.msra.mxu1 %v3382_v43  ;;  %v3214_v60 = vsel %vm2430_vm4, %v3213_v37, %v3212_v40  ;;  %v3114_v14 = vsel %vm2427_vm3, %v3113_v19, %v3112_v42  ;;  %v3115_v12 = vrot.slane %v4130_v9, 3 }
 0x1b9   :  { %v3109_v56 = vsel %vm2442_vm7, %v3108_v39, %v3107_v59  ;;  %v3216_v4 = vsel %vm2433_vm6, %v3215_v2, %v3214_v60  ;;  %3692 = vmatprep.subr.mxu1 %v3381_v24  ;;  %v3117_v13 = vrot.slane %v4148_v34, 2  ;;  %v3119_v61 = vrot.slane %v4150_v35, 1 }
 0x1ba   :  { %3687 = vmatprep.mubr.msk.f32.mxu0 %vm2458_vm9, %v3109_v56  ;;  %v3218_v16 = vsel %vm2436_vm5, %v3217_v23, %v3216_v4  ;;  %3693 = vmatpush3.msra.mxu1 %v3381_v24  ;;  %v3116_v6 = vsel %vm2430_vm4, %v3115_v12, %v3114_v14  ;;  %v3122_v19 = vrot.slane %v4171_v25, 7  ;;  %v3224_v26 = vsel %vm2424_vm2, %v3223_v7, %v3222_v62 }
 0x1bb   :  { %v3220_v46 = vsel %vm2439_vm8, %v3219_v41, %v3218_v16  ;;  %v3118_v15 = vsel %vm2433_vm6, %v3117_v13, %v3116_v6  ;;  %v3226_v27 = vsel %vm2427_vm3, %v3225_v0, %v3224_v26  ;;  %v3227_v28 = vrot.slane %v4130_v9, 4 }
 0x1bc   :  { %v3221_v32 = vsel %vm2442_vm7, %v4084_v17, %v3220_v46  ;;  %v3120_v43 = vsel %vm2436_vm5, %v3119_v61, %v3118_v15  ;;  %v3229_v47 = vrot.slane %v4148_v34, 3  ;;  %v3231_v48 = vrot.slane %v4150_v35, 2 }
 0x1bd   :  { %3694 = vmatprep.mubr.msk.f32.mxu1 %vm2458_vm9, %v3221_v32  ;;  %v3121_v62 = vsel %vm2439_vm8, %v4169_v20, %v3120_v43  ;;  %v3228_v7 = vsel %vm2430_vm4, %v3227_v28, %v3226_v27  ;;  %v3233_v8 = vrot.slane %v4169_v20, 1 }
 0x1be   :  { %v3123_v9 = vsel %vm2442_vm7, %v3122_v19, %v3121_v62  ;;  %v3230_v0 = vsel %vm2433_vm6, %v3229_v47, %v3228_v7 }
 0x1bf   :  { %3688 = vmatmul.mubr.msk.f32.vlgmr.msra.gmra.mxu0 %vm2458_vm9, %v3123_v9  ;;  %v3232_v17 = vsel %vm2436_vm5, %v3231_v48, %v3230_v0 }
 0x1c0   :  { %v3234_v34 = vsel %vm2439_vm8, %v3233_v8, %v3232_v17 }
 0x1c1   :  { %v3235_v35 = vsel %vm2442_vm7, %v4171_v25, %v3234_v34 }
 0x1c2   :  { %3695 = vmatmul.mubr.msk.f32.vlgmr.msra.gmra.mxu1 %vm2458_vm9, %v3235_v35 }
 0x267   :  { %v3647_v44 = vpop.f32.mrf.mxu0  ;;  %v3654_v49 = vpop.f32.mrf.mxu1 }
 0x268   :  { %v2642_v5 = vadd.f32 %v3654_v49, %v3647_v44 }
 0x269   :  { %v2529_v50 = vpop.f32.mrf.mxu0  ;;  %v2636_v20 = vpop.f32.mrf.mxu1 }
 0x26a   :  { %v2637_v33 = vadd.f32 %v2636_v20, %v2529_v50 }
 0x26c   :  { %v3661_v57 = vpop.f32.mrf.mxu0  ;;  %v3668_v22 = vpop.f32.mrf.mxu1 }
 0x26d   :  { %v2756_v53 = vadd.f32 %v3661_v57, %v2642_v5 }
 0x26e   :  { %v2746_v21 = vpop.f32.mrf.mxu0  ;;  %v2858_v58 = vpop.f32.mrf.mxu1 }
 0x26f   :  { %v2755_v11 = vadd.f32 %v2746_v21, %v2637_v33  ;;  %v2868_v63 = vadd.f32 %v3668_v22, %v2756_v53 }
 0x271   :  { %v2867_v29 = vadd.f32 %v2858_v58, %v2755_v11 }
 0x273   :  { %v3675_v18 = vpop.f32.mrf.mxu0 }
 0x274   :  { %v2980_v36 = vadd.f32 %v3675_v18, %v2868_v63 }
 0x275   :  { %v2970_v38 = vpop.f32.mrf.mxu0 }
 0x276   :  { %v2979_v51 = vadd.f32 %v2970_v38, %v2867_v29 }
 0x277   :  { %v3682_v25 = vpop.f32.mrf.mxu1 }
 0x278   :  { %v3092_v55 = vadd.f32 %v3682_v25, %v2980_v36 }
 0x279   :  { %v3082_v30 = vpop.f32.mrf.mxu1 }
 0x27a   :  { %v3091_v39 = vadd.f32 %v3082_v30, %v2979_v51 }
 0x27f   :  { %v3689_v52 = vpop.f32.mrf.mxu0 }
 0x280   :  { %v3204_v3 = vadd.f32 %v3689_v52, %v3092_v55 }
 0x281   :  { %v3194_v1 = vpop.f32.mrf.mxu0 }
 0x282   :  { %v3696_v10 = vpop.f32.mrf.mxu1  ;;  %v3203_v37 = vadd.f32 %v3194_v1, %v3091_v39 }
 0x283   :  { %v3316_v45 = vadd.f32 %v3696_v10, %v3204_v3 }
 0x284   :  { %v3306_v54 = vpop.f32.mrf.mxu1 }
 0x285   :  { %3318 = vst.msk [vmem:[%s4393_s4 + $0x8] sm:$0xff] %vm2458_vm9, %v3316_v45  ;;  %v3315_v2 = vadd.f32 %v3306_v54, %v3203_v37 }
 0x287   :  { %3317 = vst.msk [vmem:[%s4393_s4] sm:$0xff] %vm2458_vm9, %v3315_v2 }

</bundles_post_ra>
